<compile_context>
chip_gen: v7x
topology: tpu7x:2x2x1
jax: 0.10.0
libtpu: 0.0.40
codegen_flags: <defaults>
</compile_context>

<pallas_src>
import functools

import jax
import jax.numpy as jnp
from jax.experimental import pallas as pl
from jax.experimental.pallas import tpu as pltpu

BN_EPS = 1e-5


def _chip_generation():
    """Best-effort TPU generation (2..7); defaults to 6 (v6e-like) when unknown."""
    try:
        kind = jax.devices()[0].device_kind.lower()
    except Exception:
        return 6
    for g in (7, 6, 5, 4, 3, 2):
        if f"v{g}" in kind:
            return g
    return 6


def critic_kernel(state_ref, action_ref, w1_ref, b1_ref, w2s_ref, w2a_ref,
                  b2_ref, w3_ref, b3_ref, out_ref, *, mxu_action, bf16_epilogue):
    # --- fc1 (BatchNorm affine already folded into w1/b1 in f32 by the wrapper) ---
    xs = jnp.dot(state_ref[...], w1_ref[...],
                 preferred_element_type=jnp.float32)                     # (bB, F1) f32
    if bf16_epilogue:
        # v6e/v7x: packed bf16 VALU epilogue; xs is already bf16 for the fc2 MXU pass.
        xs = jnp.maximum(xs.astype(jnp.bfloat16) + b1_ref[...], 0.0)
    else:
        # v5e: no bf16 VALU -> f32 epilogue, cast only for the MXU.
        xs = jnp.maximum(xs + b1_ref[...], 0.0).astype(jnp.bfloat16)

    # --- fc2 over concat([xs, action]) as a split contraction ---
    h = jnp.dot(xs, w2s_ref[...], preferred_element_type=jnp.float32)    # (bB, F2) f32
    if mxu_action:
        # v6e/v7x are VALU-bound here; the K=A (padded) MXU pass is essentially free.
        h = h + jnp.dot(action_ref[...], w2a_ref[...],
                        preferred_element_type=jnp.float32)
    else:
        # v5e is MXU-bound; keep the tiny-K action branch on the VPU.
        action = action_ref[...]                                         # (bB, A) f32
        w2a = w2a_ref[...]                                               # (A,  F2) f32
        for k in range(w2a.shape[0]):                                    # static unroll
            h = h + action[:, k:k + 1] * w2a[k:k + 1, :]
    h = jnp.maximum(h + b2_ref[...], 0.0)                                # (bB, F2) f32

    # --- fc3 (N=1): VPU multiply + XLU lane reduce instead of a degenerate matmul ---
    q = jnp.sum(h * w3_ref[...], axis=-1, keepdims=True) + b3_ref[0]
    out_ref[...] = q.astype(out_ref.dtype)                               # (bB, 1)


def critic_forward(state, action, params, *, block_b=None):
    B, S = state.shape
    A = action.shape[1]
    F1 = params["w1"].shape[1]
    F2 = params["w2s"].shape[1]

    gen = _chip_generation()
    mxu_action = gen >= 6       # v6e/v7x: action branch on the (idle) MXU
    bf16_epilogue = gen >= 6    # v6e/v7x: bf16 VALU available
    is_v7 = gen >= 7

    # --- BatchNorm1d (training mode) stats over the FULL batch, folded into fc1 ---
    mean = jnp.mean(state, axis=0, keepdims=True)
    var = jnp.mean(jnp.square(state - mean), axis=0, keepdims=True)
    inv_std = jax.lax.rsqrt(var + BN_EPS)
    scale = params["gamma"] * inv_std                                    # (1, S)
    shift = params["beta"] - mean * params["gamma"] * inv_std            # (1, S)
    # Fold in f32 FIRST, then cast the MXU operand to bf16.
    w1_folded = (params["w1"] * scale.reshape(S, 1)).astype(jnp.float32)
    b1_folded = (params["b1"] + shift @ params["w1"]).astype(jnp.float32)

    w1_bf = w1_folded.astype(jnp.bfloat16)
    b1_in = b1_folded.astype(jnp.bfloat16) if bf16_epilogue else b1_folded
    w2s_bf = params["w2s"].astype(jnp.bfloat16)
    w2a_in = params["w2a"].astype(jnp.bfloat16 if mxu_action else jnp.float32)
    b2 = params["b2"].astype(jnp.float32)
    w3_row = params["w3"].reshape(1, F2).astype(jnp.float32)
    b3 = params["b3"].reshape((1,)).astype(jnp.float32)

    state_in = state.astype(jnp.bfloat16)
    action_in = action.astype(jnp.bfloat16 if mxu_action else jnp.float32)

    # --- generation-aware batch tile ---
    if block_b is None:
        cap = 1024 if is_v7 else 2048        # v7x: 64 MiB VMEM; v5e/v6e: 128 MiB
        block_b = None
        for cand in (4096, 2048, 1024, 512, 256, 128, 64, 32, 16, 8):
            if cand <= cap and B % cand == 0:
                block_b = cand
                break
        if block_b is None:
            block_b = min(cap, 128)          # awkward batch size: pad below
        # v7x megacore: guarantee >=2 parallel grid steps so both TCs get work.
        if is_v7 and block_b >= 16 and pl.cdiv(B, block_b) < 2:
            block_b //= 2

    n_steps = pl.cdiv(B, block_b)
    B_pad = n_steps * block_b
    if B_pad != B:
        pad = B_pad - B
        state_in = jnp.pad(state_in, ((0, pad), (0, 0)))
        action_in = jnp.pad(action_in, ((0, pad), (0, 0)))

    vmem_limit = (40 if is_v7 else 64) * 1024 * 1024

    # Advisory cost estimate so XLA overlaps the BN reduction / casts around the call.
    operands = (state_in, action_in, w1_bf, b1_in, w2s_bf, w2a_in, b2, w3_row, b3)
    flops = 2 * B_pad * (S * F1 + (F1 + A) * F2 + F2)
    bytes_accessed = sum(int(o.size) * o.dtype.itemsize for o in operands) + B_pad * 4

    tiled = lambda bs: pl.BlockSpec(bs, lambda i: (i, 0))        # streams with batch
    resident = lambda bs: pl.BlockSpec(bs, lambda i: (0, 0))     # fetched once, stays in VMEM

    out = pl.pallas_call(
        functools.partial(critic_kernel,
                          mxu_action=mxu_action, bf16_epilogue=bf16_epilogue),
        out_shape=jax.ShapeDtypeStruct((B_pad, 1), jnp.float32),
        grid=(n_steps,),
        in_specs=[
            tiled((block_b, S)),                                 # state (bf16)
            tiled((block_b, A)),                                 # action
            resident((S, F1)),                                   # w1 (bf16, BN folded)
            resident((1, F1)),                                   # b1 (bf16 on v6e/v7x)
            resident((F1, F2)),                                  # w2 state rows (bf16)
            resident((A, F2)),                                   # w2 action rows
            resident((1, F2)),                                   # b2
            resident((1, F2)),                                   # w3 row
            pl.BlockSpec(memory_space=pltpu.MemorySpace.SMEM),   # b3 scalar
        ],
        out_specs=tiled((block_b, 1)),
        compiler_params=pltpu.CompilerParams(
            dimension_semantics=("parallel",),                   # shard batch across TCs
            vmem_limit_bytes=vmem_limit,
        ),
        cost_estimate=pl.CostEstimate(flops=flops, transcendentals=0,
                                      bytes_accessed=bytes_accessed),
    )(state_in, action_in, w1_bf, b1_in, w2s_bf, w2a_in, b2, w3_row, b3)

    return out[:B] if B_pad != B else out


def init_params(key, state_size, action_size, fcs1_units=512, fc2_units=512):
    ks = jax.random.split(key, 6)
    lim1 = 1.0 / jnp.sqrt(fcs1_units)   # matches hidden_init (uses weight.size()[0])
    lim2 = 1.0 / jnp.sqrt(fc2_units)
    w1 = jax.random.uniform(ks[0], (state_size, fcs1_units), jnp.float32, -lim1, lim1)
    b1 = jax.random.uniform(ks[1], (1, fcs1_units), jnp.float32,
                            -1.0 / jnp.sqrt(state_size), 1.0 / jnp.sqrt(state_size))
    w2 = jax.random.uniform(ks[2], (fcs1_units + action_size, fc2_units),
                            jnp.float32, -lim2, lim2)
    b2 = jax.random.uniform(ks[3], (1, fc2_units), jnp.float32,
                            -1.0 / jnp.sqrt(fcs1_units + action_size),
                            1.0 / jnp.sqrt(fcs1_units + action_size))
    w3 = jax.random.uniform(ks[4], (fc2_units, 1), jnp.float32, -3e-3, 3e-3)
    b3 = jax.random.uniform(ks[5], (1, 1), jnp.float32,
                            -1.0 / jnp.sqrt(fc2_units), 1.0 / jnp.sqrt(fc2_units))
    return {
        "gamma": jnp.ones((1, state_size), jnp.float32),
        "beta": jnp.zeros((1, state_size), jnp.float32),
        "w1": w1, "b1": b1,
        "w2s": w2[:fcs1_units, :],        # rows multiplying xs
        "w2a": w2[fcs1_units:, :],        # rows multiplying action
        "b2": b2,
        "w3": w3, "b3": b3,
    }


def critic_reference(state, action, p):
    """Pure-JAX f32 reference (matches the PyTorch forward in training mode)."""
    mean = jnp.mean(state, axis=0, keepdims=True)
    var = jnp.mean((state - mean) ** 2, axis=0, keepdims=True)
    sn = (state - mean) / jnp.sqrt(var + BN_EPS) * p["gamma"] + p["beta"]
    xs = jnp.maximum(sn @ p["w1"] + p["b1"], 0.0)
    h = jnp.maximum(xs @ p["w2s"] + action @ p["w2a"] + p["b2"], 0.0)
    return h @ p["w3"] + p["b3"]


if __name__ == "__main__":
    B, STATE, ACTION = 256, 16, 4
    key = jax.random.PRNGKey(0)
    k_s, k_a, k_p = jax.random.split(key, 3)
    state = jax.random.normal(k_s, (B, STATE), jnp.float32)
    action = jax.random.normal(k_a, (B, ACTION), jnp.float32)
    params = init_params(k_p, STATE, ACTION)

    # block_b=128 -> 2-step batch grid: exercises tiling + VMEM-resident weights
    # (and both TensorCores on v7x).
    out = critic_forward(state, action, params, block_b=128)
    out = jax.block_until_ready(out)

    ref = critic_reference(state, action, params)
    assert out.shape == (B, 1)
    # Tolerance accounts for bf16 MXU operands / folded-BN bf16 rounding.
    assert jnp.allclose(out, ref, atol=2e-2, rtol=2e-2), (out, ref)
    print("KERNEL_OK")
</pallas_src>

<mosaic_0001>
module attributes {stable_mosaic.version = 11 : i64} {
  func.func @critic_kernel(%arg0: i32, %arg1: memref<128x16xbf16, #tpu.memory_space<vmem>>, %arg2: memref<128x4xbf16, #tpu.memory_space<vmem>>, %arg3: memref<16x512xbf16, #tpu.memory_space<vmem>>, %arg4: memref<1x512xbf16, #tpu.memory_space<vmem>>, %arg5: memref<512x512xbf16, #tpu.memory_space<vmem>>, %arg6: memref<4x512xbf16, #tpu.memory_space<vmem>>, %arg7: memref<1x512xf32, #tpu.memory_space<vmem>>, %arg8: memref<1x512xf32, #tpu.memory_space<vmem>>, %arg9: memref<1xf32, #tpu.memory_space<smem>>, %arg10: memref<128x1xf32, #tpu.memory_space<vmem>>) attributes {dimension_semantics = [#tpu.dimension_semantics<parallel>], iteration_bounds = array<i64: 2>, scalar_prefetch = 0 : i64, scratch_operands = 0 : i64, tpu.core_type = #tpu.core_type<tc>, window_params = [{transform_indices = @transform_0, window_bounds = array<i64: 128, 16>}, {transform_indices = @transform_1, window_bounds = array<i64: 128, 4>}, {pipeline_mode = #tpu.pipeline_mode<synchronous>, transform_indices = @transform_2, window_bounds = array<i64: 16, 512>}, {pipeline_mode = #tpu.pipeline_mode<synchronous>, transform_indices = @transform_3, window_bounds = array<i64: 1, 512>}, {pipeline_mode = #tpu.pipeline_mode<synchronous>, transform_indices = @transform_4, window_bounds = array<i64: 512, 512>}, {pipeline_mode = #tpu.pipeline_mode<synchronous>, transform_indices = @transform_5, window_bounds = array<i64: 4, 512>}, {pipeline_mode = #tpu.pipeline_mode<synchronous>, transform_indices = @transform_6, window_bounds = array<i64: 1, 512>}, {pipeline_mode = #tpu.pipeline_mode<synchronous>, transform_indices = @transform_7, window_bounds = array<i64: 1, 512>}, {transform_indices = @transform_8, window_bounds = array<i64: 1>}, {transform_indices = @transform_9, window_bounds = array<i64: 128, 1>}]} {
    %c0 = arith.constant 0 : index
    %c0_0 = arith.constant 0 : index
    %0 = vector.load %arg1[%c0, %c0_0] : memref<128x16xbf16, #tpu.memory_space<vmem>>, vector<128x16xbf16>
    %c0_1 = arith.constant 0 : index
    %c0_2 = arith.constant 0 : index
    %1 = vector.load %arg3[%c0_1, %c0_2] : memref<16x512xbf16, #tpu.memory_space<vmem>>, vector<16x512xbf16>
    %cst = arith.constant dense<0.000000e+00> : vector<128x512xf32>
    %2 = tpu.matmul %0, %1, %cst {dimension_numbers = #tpu.dot_dimension_numbers<[1], [0], [0], [1], [0, 0, 1, 1], [], []>} : vector<128x16xbf16>, vector<16x512xbf16>, vector<128x512xf32> -> vector<128x512xf32>
    %3 = arith.truncf %2 : vector<128x512xf32> to vector<128x512xbf16>
    %c0_3 = arith.constant 0 : index
    %c0_4 = arith.constant 0 : index
    %4 = vector.load %arg4[%c0_3, %c0_4] : memref<1x512xbf16, #tpu.memory_space<vmem>>, vector<1x512xbf16>
    %5 = vector.broadcast %4 : vector<1x512xbf16> to vector<128x512xbf16>
    %6 = arith.addf %3, %5 : vector<128x512xbf16>
    %cst_5 = arith.constant 0.000000e+00 : bf16
    %7 = vector.broadcast %cst_5 : bf16 to vector<128x512xbf16>
    %8 = arith.maximumf %6, %7 : vector<128x512xbf16>
    %c0_6 = arith.constant 0 : index
    %c0_7 = arith.constant 0 : index
    %9 = vector.load %arg5[%c0_6, %c0_7] : memref<512x512xbf16, #tpu.memory_space<vmem>>, vector<512x512xbf16>
    %cst_8 = arith.constant dense<0.000000e+00> : vector<128x512xf32>
    %10 = tpu.matmul %8, %9, %cst_8 {dimension_numbers = #tpu.dot_dimension_numbers<[1], [0], [0], [1], [0, 0, 1, 1], [], []>} : vector<128x512xbf16>, vector<512x512xbf16>, vector<128x512xf32> -> vector<128x512xf32>
    %c0_9 = arith.constant 0 : index
    %c0_10 = arith.constant 0 : index
    %11 = vector.load %arg2[%c0_9, %c0_10] : memref<128x4xbf16, #tpu.memory_space<vmem>>, vector<128x4xbf16>
    %c0_11 = arith.constant 0 : index
    %c0_12 = arith.constant 0 : index
    %12 = vector.load %arg6[%c0_11, %c0_12] : memref<4x512xbf16, #tpu.memory_space<vmem>>, vector<4x512xbf16>
    %cst_13 = arith.constant dense<0.000000e+00> : vector<128x512xf32>
    %13 = tpu.matmul %11, %12, %cst_13 {dimension_numbers = #tpu.dot_dimension_numbers<[1], [0], [0], [1], [0, 0, 1, 1], [], []>} : vector<128x4xbf16>, vector<4x512xbf16>, vector<128x512xf32> -> vector<128x512xf32>
    %14 = arith.addf %10, %13 : vector<128x512xf32>
    %c0_14 = arith.constant 0 : index
    %c0_15 = arith.constant 0 : index
    %15 = vector.load %arg7[%c0_14, %c0_15] : memref<1x512xf32, #tpu.memory_space<vmem>>, vector<1x512xf32>
    %16 = vector.broadcast %15 : vector<1x512xf32> to vector<128x512xf32>
    %17 = arith.addf %14, %16 : vector<128x512xf32>
    %cst_16 = arith.constant 0.000000e+00 : f32
    %18 = vector.broadcast %cst_16 : f32 to vector<128x512xf32>
    %19 = arith.maximumf %17, %18 : vector<128x512xf32>
    %c0_17 = arith.constant 0 : index
    %c0_18 = arith.constant 0 : index
    %20 = vector.load %arg8[%c0_17, %c0_18] : memref<1x512xf32, #tpu.memory_space<vmem>>, vector<1x512xf32>
    %21 = vector.broadcast %20 : vector<1x512xf32> to vector<128x512xf32>
    %22 = arith.mulf %19, %21 : vector<128x512xf32>
    %cst_19 = arith.constant dense<0.000000e+00> : vector<128xf32>
    %23 = vector.multi_reduction <add>, %22, %cst_19 [1] : vector<128x512xf32> to vector<128xf32>
    %24 = vector.shape_cast %23 : vector<128xf32> to vector<128x1xf32>
    %c0_20 = arith.constant 0 : index
    %25 = memref.load %arg9[%c0_20] : memref<1xf32, #tpu.memory_space<smem>>
    %26 = vector.broadcast %25 : f32 to vector<128x1xf32>
    %27 = arith.addf %24, %26 : vector<128x1xf32>
    %c0_21 = arith.constant 0 : index
    %c0_22 = arith.constant 0 : index
    %28 = vector.load %arg10[%c0_21, %c0_22] : memref<128x1xf32, #tpu.memory_space<vmem>>, vector<128x1xf32>
    tpu.vector_store %arg10[%c0_21, %c0_22], %27 {strides = array<i32>} : memref<128x1xf32, #tpu.memory_space<vmem>>, vector<128x1xf32>,
    return
  }
  func.func @transform_0(%arg0: i32) -> (i32, i32) {
    %c0_i32 = arith.constant 0 : i32
    %c0_i32_0 = arith.constant 0 : i32
    return %arg0, %c0_i32 : i32, i32
  }
  func.func @transform_1(%arg0: i32) -> (i32, i32) {
    %c0_i32 = arith.constant 0 : i32
    %c0_i32_0 = arith.constant 0 : i32
    return %arg0, %c0_i32 : i32, i32
  }
  func.func @transform_2(%arg0: i32) -> (i32, i32) {
    %c0_i32 = arith.constant 0 : i32
    %c0_i32_0 = arith.constant 0 : i32
    %c0_i32_1 = arith.constant 0 : i32
    return %c0_i32, %c0_i32_0 : i32, i32
  }
  func.func @transform_3(%arg0: i32) -> (i32, i32) {
    %c0_i32 = arith.constant 0 : i32
    %c0_i32_0 = arith.constant 0 : i32
    %c0_i32_1 = arith.constant 0 : i32
    return %c0_i32, %c0_i32_0 : i32, i32
  }
  func.func @transform_4(%arg0: i32) -> (i32, i32) {
    %c0_i32 = arith.constant 0 : i32
    %c0_i32_0 = arith.constant 0 : i32
    %c0_i32_1 = arith.constant 0 : i32
    return %c0_i32, %c0_i32_0 : i32, i32
  }
  func.func @transform_5(%arg0: i32) -> (i32, i32) {
    %c0_i32 = arith.constant 0 : i32
    %c0_i32_0 = arith.constant 0 : i32
    %c0_i32_1 = arith.constant 0 : i32
    return %c0_i32, %c0_i32_0 : i32, i32
  }
  func.func @transform_6(%arg0: i32) -> (i32, i32) {
    %c0_i32 = arith.constant 0 : i32
    %c0_i32_0 = arith.constant 0 : i32
    %c0_i32_1 = arith.constant 0 : i32
    return %c0_i32, %c0_i32_0 : i32, i32
  }
  func.func @transform_7(%arg0: i32) -> (i32, i32) {
    %c0_i32 = arith.constant 0 : i32
    %c0_i32_0 = arith.constant 0 : i32
    %c0_i32_1 = arith.constant 0 : i32
    return %c0_i32, %c0_i32_0 : i32, i32
  }
  func.func @transform_8(%arg0: i32) -> i32 {
    %c0_i32 = arith.constant 0 : i32
    %c0_i32_0 = arith.constant 0 : i32
    return %c0_i32 : i32
  }
  func.func @transform_9(%arg0: i32) -> (i32, i32) {
    %c0_i32 = arith.constant 0 : i32
    %c0_i32_0 = arith.constant 0 : i32
    return %arg0, %c0_i32 : i32, i32
  }
}

</mosaic_0001>

<bundles_post_ra>
// kernel: tpu_custom_call.1
= control target key start
LH: loop header
LB: loop body
LE: loop exit
PB: predicated region body
PF: predicated region fallthrough
CT: control target
= control target key end

     0   :  { %s4991_s0 = inlined_call_operand.hbm [shape: bf16[256,16], index: 0, kind: input, shape index: {}]   ;;  %s4992_s1 = inlined_call_operand.hbm [shape: bf16[256,4], index: 1, kind: input, shape index: {}]   ;;  %s4993_s2 = inlined_call_operand.hbm [shape: bf16[16,512], index: 2, kind: input, shape index: {}]   ;;  %s4994_s3 = inlined_call_operand.hbm [shape: bf16[1,512], index: 3, kind: input, shape index: {}]   ;;  %s4995_s4 = inlined_call_operand.hbm [shape: bf16[512,512], index: 4, kind: input, shape index: {}]   ;;  %s4996_s5 = inlined_call_operand.hbm [shape: bf16[4,512], index: 5, kind: input, shape index: {}]   ;;  %s4997_s6 = inlined_call_operand.hbm [shape: f32[1,512], index: 6, kind: input, shape index: {}]   ;;  %s4998_s7 = inlined_call_operand.hbm [shape: f32[1,512], index: 7, kind: input, shape index: {}]   ;;  %s4999_s8 = inlined_call_operand.<no memory space> [shape: f32[1], index: 8, kind: input, shape index: {}]   ;;  %s5000_s9 = inlined_call_operand.hbm [shape: f32[256,1], index: 9, kind: output, shape index: {}]  }
   0x1   :  { %5006 = sst [smem:[#allocation25_spill]] %s4991_s0 }
   0x2   :  { %5007 = sst [smem:[#allocation26_spill]] %s4993_s2 }
   0x3   :  { %5008 = sst [smem:[#allocation27_spill]] %s4994_s3 }
   0x4   :  { %5009 = sst [smem:[#allocation28_spill]] %s4995_s4 }
   0x5   :  { %5010 = sst [smem:[#allocation29_spill]] %s4996_s5 }
   0x6   :  { %14 = sst [smem:[#allocation2]] %s4999_s8 }
   0x7   :  { %15 = vsyncpa [#allocation4], 0 }
   0x8   :  { %17 = vsyncpa [#allocation4 + $0x1], 0 }
   0x9   :  { %18 = vsyncpa [#allocation7], 0 }
   0xa   :  { %20 = vsyncpa [#allocation7 + $0x1], 0 }
   0xb   :  { %21 = vsyncpa [#allocation10], 0 }
   0xc   :  { %22 = vsyncpa [#allocation13], 0 }
   0xd   :  { %23 = vsyncpa [#allocation16], 0 }
   0xe   :  { %24 = vsyncpa [#allocation5], 0 }
   0xf   :  { %26 = vsyncpa [#allocation5 + $0x1], 0  ;;  %s4100_s11 = smov 0   ;;  %s4102_s12 = smov 0  }
  0x10   :  { %s4104_s13 = smov 0   ;;  %s4106_s14 = smov 0  }
  0x11 LB: > { %s4029_s8 = smov [#allocation8]   ;;  %s4121_s16 = sadd.s32 4294967295, %s4027_s14   ;;  %s4027_s14 = sphi %s4106_s14, %s5042_s14   ;;  %s4023_s13 = sphi %s4104_s13, %s5041_s13   ;;  %s4019_s12 = sphi %s4102_s12, %s5040_s12   ;;  %s4015_s11 = sphi %s4100_s11, %s5039_s11  }
  0x12   : > { %s274_s15 = sshll.u32 %s4029_s8, 4  ;;  %p3034_p0 = scmp.ge.s32.totalorder %s4027_s14, 1  ;;  %s4126_s15 = int_to_ptr.vmem [resolvable:$true] %s274_s15 }
  0x13   : > { %p5002_p1 = scmp.eq.s32.totalorder %s4121_s16, 0  ;;  %p262_p2 = scmp.lt.s32.totalorder %s4027_s14, 3 }
  0x14   : > { %s4030_s18 = smov [#allocation9]   ;;  %s4031_s21 = smov [#allocation12]  }
  0x15   : > { %p4128_p3 = pnand %p3034_p0, %p262_p2  ;;  %s288_s19 = sshll.u32 %s4030_s18, 4  ;;  %s4141_s19 = int_to_ptr.vmem [resolvable:$true] %s288_s19 }
  0x16   : > { %s312_s22 = sshll.u32 %s4031_s21, 4  ;;  %s5013_s2 = sld [smem:[#allocation26_spill]]  ;;  %s4143_s22 = int_to_ptr.vmem [resolvable:$true] %s312_s22 }
  0x17   : > { %s5011_s17 = scalar_select %p4128_p3, 1, 0 }
  0x18   : > { %p3407_p5 = pneg %p4128_p3 }
  0x1a   : > { %p4137_p6 = pnand %p3407_p5, %p5002_p1 }
  0x1c   : > { %s3713_s25 = scalar_lea.hbm %s5013_s2, 512  ;;  %p4153_p8 = pneg %p4137_p6 }
  0x1d   : > { %p3714_p7 = scmp.ne.s32.totalorder %s5013_s2, %s3713_s25  ;;  %p3720_p11 = scmp.lt.u32.totalorder %s3713_s25, %s5013_s2 }
  0x1f   : > { %p3716_p9 = pnand %p4153_p8, %p3714_p7 }
  0x21   : > { %p3717_p10 = pneg %p3716_p9 }
  0x23   : > { %p3722_p12 = pnand %p3720_p11, %p3717_p10 }
  0x25   : > { %3725 = shalt.err (!%p3722_p12)
}
  0x26   : > { %s3726_s10 = scalar_lea.vmem %s4126_s15, 512  ;;  %p3734_p5 = scmp.lt.s32.totalorder %s4126_s15, %s4126_s15 }
  0x27   : > { %p3727_p13 = scmp.ne.s32.totalorder %s4126_s15, %s3726_s10  ;;  %p3735_p4 = scmp.lt.s32.totalorder %s3726_s10, %s3726_s10 }
  0x29   : > { %p3729_p0 = pnand %p3727_p13, %p4153_p8  ;;  %p3736_p7 = por %p3735_p4, %p3734_p5 }
  0x2b   : > { %p3730_p2 = pneg %p3729_p0 }
  0x2d   : > { %p3737_p9 = pnand %p3736_p7, %p3730_p2 }
  0x2f   : > { %3740 = shalt.err (!%p3737_p9)
}
  0x30   : > { %s5001_s8 = smov 256   ;;  %s4033_s18 = smov 16  }
  0x31   : > { %3410 = dma.hbm_to_vmem [thread:$0]  (!%p4137_p6), %s5013_s2, 512, %s4126_s15, [#allocation7], %s5001_s8, %s5001_s8, %s4033_s18  }
  0x32   : > { %s5015_s3 = sld [smem:[#allocation27_spill]] }
  0x38   : > { %s3741_s26 = scalar_lea.hbm %s5015_s3, 64 }
  0x39   : > { %p3742_p4 = scmp.ne.s32.totalorder %s5015_s3, %s3741_s26  ;;  %p3748_p12 = scmp.lt.u32.totalorder %s3741_s26, %s5015_s3 }
  0x3b   : > { %p3744_p10 = pnand %p3742_p4, %p4153_p8 }
  0x3d   : > { %p3745_p11 = pneg %p3744_p10 }
  0x3f   : > { %p3750_p13 = pnand %p3748_p12, %p3745_p11 }
  0x41   : > { %3753 = shalt.err (!%p3750_p13)
}
  0x42   : > { %s3754_s15 = scalar_lea.vmem %s4141_s19, 64  ;;  %p3762_p7 = scmp.lt.s32.totalorder %s4141_s19, %s4141_s19 }
  0x43   : > { %p3755_p0 = scmp.ne.s32.totalorder %s4141_s19, %s3754_s15  ;;  %p3763_p9 = scmp.lt.s32.totalorder %s3754_s15, %s3754_s15 }
  0x45   : > { %p3757_p2 = pnand %p3755_p0, %p4153_p8  ;;  %p3764_p4 = por %p3763_p9, %p3762_p7 }
  0x47   : > { %p3758_p5 = pneg %p3757_p2 }
  0x49   : > { %p3765_p10 = pnand %p3764_p4, %p3758_p5 }
  0x4b   : > { %3768 = shalt.err (!%p3765_p10)
}
  0x4c   : > { %3413 = dma.hbm_to_vmem [thread:$0]  (!%p4137_p6), %s5015_s3, 64, %s4141_s19, [#allocation10]  }
  0x4d   : > { %s5016_s5 = sld [smem:[#allocation29_spill]] }
  0x53   : > { %s3769_s26 = scalar_lea.hbm %s5016_s5, 128 }
  0x54   : > { %p3770_p11 = scmp.ne.s32.totalorder %s5016_s5, %s3769_s26  ;;  %p3776_p0 = scmp.lt.u32.totalorder %s3769_s26, %s5016_s5 }
  0x56   : > { %p3772_p12 = pnand %p3770_p11, %p4153_p8 }
  0x58   : > { %p3773_p13 = pneg %p3772_p12 }
  0x5a   : > { %p3778_p2 = pnand %p3776_p0, %p3773_p13 }
  0x5c   : > { %3781 = shalt.err (!%p3778_p2)
}
  0x5d   : > { %s3782_s19 = scalar_lea.vmem %s4143_s22, 128  ;;  %p3790_p4 = scmp.lt.s32.totalorder %s4143_s22, %s4143_s22 }
  0x5e   : > { %p3783_p5 = scmp.ne.s32.totalorder %s4143_s22, %s3782_s19  ;;  %p3791_p10 = scmp.lt.s32.totalorder %s3782_s19, %s3782_s19 }
  0x60   : > { %p3785_p7 = pnand %p3783_p5, %p4153_p8  ;;  %p3792_p11 = por %p3791_p10, %p3790_p4 }
  0x62   : > { %p3786_p9 = pneg %p3785_p7 }
  0x64   : > { %p3793_p12 = pnand %p3792_p11, %p3786_p9 }
  0x66   : > { %3796 = shalt.err (!%p3793_p12)
}
  0x67   : > { %3419 = dma.hbm_to_vmem [thread:$0]  (!%p4137_p6), %s5016_s5, 128, %s4143_s22, [#allocation13]  }
  0x68   : > { %s4034_s23 = smov [#allocation11]   ;;  %s4035_s25 = smov [#allocation14]  }
  0x69   : > { %s298_s24 = sshll.u32 %s4034_s23, 4  ;;  %s323_s26 = sshll.u32 %s4035_s25, 4  ;;  %s299_s24 = int_to_ptr.vmem [resolvable:$true] %s298_s24  ;;  %s324_s26 = int_to_ptr.vmem [resolvable:$true] %s323_s26 }
  0x6a   : > { %s5017_s4 = sld [smem:[#allocation28_spill]] }
  0x70   : > { %s3797_s30 = scalar_lea.hbm %s5017_s4, 16384 }
  0x71   : > { %p3798_p13 = scmp.ne.s32.totalorder %s5017_s4, %s3797_s30  ;;  %p3804_p5 = scmp.lt.u32.totalorder %s3797_s30, %s5017_s4 }
  0x73   : > { %p3800_p0 = pnand %p3798_p13, %p4153_p8 }
  0x75   : > { %p3801_p2 = pneg %p3800_p0 }
  0x77   : > { %p3806_p7 = pnand %p3804_p5, %p3801_p2 }
  0x79   : > { %3809 = shalt.err (!%p3806_p7)
}
  0x7a   : > { %s3810_s22 = scalar_lea.vmem %s299_s24, 16384  ;;  %p3818_p11 = scmp.lt.s32.totalorder %s299_s24, %s299_s24 }
  0x7b   : > { %p3811_p9 = scmp.ne.s32.totalorder %s299_s24, %s3810_s22  ;;  %p3819_p12 = scmp.lt.s32.totalorder %s3810_s22, %s3810_s22 }
  0x7d   : > { %p3813_p4 = pnand %p3811_p9, %p4153_p8  ;;  %p3820_p1 = por %p3819_p12, %p3818_p11 }
  0x7f   : > { %p3814_p10 = pneg %p3813_p4 }
  0x81   : > { %p3821_p3 = pnand %p3820_p1, %p3814_p10 }
  0x83   : > { %3824 = shalt.err (!%p3821_p3)
}
  0x84   : > { %s5018_s21 = smov 256   ;;  %s3825_s29 = scalar_lea.hbm %s4997_s6, 64 }
  0x85   : > { %3416 = dma.hbm_to_vmem [thread:$0]  (!%p4137_p6), %s5017_s4, 16384, %s299_s24, [#allocation10], %s5018_s21, %s5018_s21, %s4033_s18  }
  0x86   : > { %p3826_p1 = scmp.ne.s32.totalorder %s4997_s6, %s3825_s29  ;;  %p3832_p0 = scmp.lt.u32.totalorder %s3825_s29, %s4997_s6 }
  0x88   : > { %p3828_p3 = pnand %p3826_p1, %p4153_p8 }
  0x8a   : > { %p3829_p13 = pneg %p3828_p3 }
  0x8c   : > { %p3834_p2 = pnand %p3832_p0, %p3829_p13 }
  0x8e   : > { %3837 = shalt.err (!%p3834_p2)
}
  0x8f   : > { %s3838_s22 = scalar_lea.vmem %s324_s26, 64  ;;  %p3846_p4 = scmp.lt.s32.totalorder %s324_s26, %s324_s26 }
  0x90   : > { %p3839_p5 = scmp.ne.s32.totalorder %s324_s26, %s3838_s22  ;;  %p3847_p10 = scmp.lt.s32.totalorder %s3838_s22, %s3838_s22 }
  0x92   : > { %p3841_p7 = pnand %p3839_p5, %p4153_p8  ;;  %p3848_p11 = por %p3847_p10, %p3846_p4 }
  0x94   : > { %p3842_p9 = pneg %p3841_p7 }
  0x96   : > { %p3849_p12 = pnand %p3848_p11, %p3842_p9 }
  0x98   : > { %3852 = shalt.err (!%p3849_p12)
}
  0x99   : > { %3422 = dma.hbm_to_vmem [thread:$0]  (!%p4137_p6), %s4997_s6, 64, %s324_s26, [#allocation13]  }
  0x9a   : > { %s4036_s21 = smov [#allocation15]   ;;  %s3853_s27 = scalar_lea.hbm %s4998_s7, 64 }
  0x9b   : > { %s334_s8 = sshll.u32 %s4036_s21, 4  ;;  %p3854_p1 = scmp.ne.s32.totalorder %s4998_s7, %s3853_s27  ;;  %s335_s8 = int_to_ptr.vmem [resolvable:$true] %s334_s8 }
  0x9c   : > { %p3860_p0 = scmp.lt.u32.totalorder %s3853_s27, %s4998_s7 }
  0x9d   : > { %p3856_p3 = pnand %p3854_p1, %p4153_p8 }
  0x9f   : > { %p3857_p13 = pneg %p3856_p3 }
  0xa1   : > { %p3862_p2 = pnand %p3860_p0, %p3857_p13 }
  0xa3   : > { %3865 = shalt.err (!%p3862_p2)
}
  0xa4   : > { %s3866_s26 = scalar_lea.vmem %s335_s8, 64  ;;  %p3874_p4 = scmp.lt.s32.totalorder %s335_s8, %s335_s8 }
  0xa5   : > { %p3867_p5 = scmp.ne.s32.totalorder %s335_s8, %s3866_s26  ;;  %p3875_p10 = scmp.lt.s32.totalorder %s3866_s26, %s3866_s26 }
  0xa7   : > { %p3869_p7 = pnand %p3867_p5, %p4153_p8  ;;  %p3876_p11 = por %p3875_p10, %p3874_p4 }
  0xa9   : > { %p3870_p9 = pneg %p3869_p7 }
  0xab   : > { %p3877_p12 = pnand %p3876_p11, %p3870_p9 }
  0xad   : > { %3880 = shalt.err (!%p3877_p12)
}
  0xae   : > { %3425 = dma.hbm_to_vmem [thread:$0]  (!%p4137_p6), %s4998_s7, 64, %s335_s8, [#allocation16]  }
  0xaf   : > { %s3033_s28 = sadd.s32 4294967294, %s4027_s14   ;;  %s4282_s20 = sadd.s32 1, %s4027_s14  }
  0xb0   : > { %s36_s18 = ssub.s32 %s4027_s14, %s4282_s20  ;;  %s39_s24 = sadd.s32 1, %s4023_s13 }
  0xb1   : > { %p37_p8 = scmp.eq.s32.totalorder %s36_s18, 0  ;;  %p46_p1 = scmp.ne.s32.totalorder %s4023_s13, %s4019_s12 }
  0xb2   : > { %p47_p3 = scmp.eq.s32.totalorder %s4027_s14, 0  ;;  %p52_p13 = scmp.ne.s32.totalorder %s4019_s12, %s4015_s11 }
  0xb3   : > { %s4293_s21 = scalar_select %p37_p8, %s4023_s13, %s39_s24  }
  0xb4   : > { %p4295_p0 = por %p47_p3, %p46_p1  ;;  %p5020_p2 = scmp.eq.s32.totalorder %s4121_s16, 0 }
  0xb5   : > { %p249_p5 = scmp.eq.s32.totalorder %s4121_s16, 1  ;;  %p255_p7 = scmp.eq.s32.totalorder %s3033_s28, 1 }
  0xb6   : > { %p4301_p6 = por %p5020_p2, %p52_p13  ;;  %p3443_p9 = scmp.lt.s32.totalorder %s4027_s14, 2 }
  0xb7   : > { %s348_s25 = sand.u32 1, %s4023_s13   ;;  %p4308_p4 = por %p249_p5, %p46_p1 }
  0xb8   : > { %p4312_p10 = por %p255_p7, %p52_p13  ;;  %s4316_s30 = sshll.u32 %s348_s25, 6 }
  0xb9   : > { %s5022_s27 = scalar_select %p4308_p4, 1, 0 }
  0xba   : > { %s5023_s29 = scalar_select %p4312_p10, 1, 0 }
  0xbb   : > { %s5004_s10 = sshll.u32 %s4027_s14, 10  ;;  %s5024_s0 = sld [smem:[#allocation25_spill]] }
  0xbc   : > { %s352_s22 = scalar_lea.vmem [#allocation3], %s4316_s30  ;;  %p4331_p11 = pnand %p3443_p9, %p4295_p0 }
  0xbd   : > { %s359_s28 = sshll.u32 %s352_s22, 4  ;;  %s4335_s24 = scalar_lea.sflag [#allocation4], %s348_s25  ;;  %s4327_s28 = int_to_ptr.vmem [resolvable:$true] %s359_s28 }
  0xbe   : > { %p3883_p8 = pneg %p4331_p11 }
  0xc1   : > { %s4324_s15 = scalar_lea.hbm %s5024_s0, %s5004_s10  ;;  %s3886_s23 = scalar_lea.hbm %s5024_s0, 2048 }
  0xc2   : > { %s3881_s19 = scalar_lea.hbm %s4324_s15, 1024  ;;  %p3887_p13 = scmp.lt.u32.totalorder %s4324_s15, %s5024_s0 }
  0xc3   : > { %p3882_p12 = scmp.ne.s32.totalorder %s4324_s15, %s3881_s19  ;;  %p3888_p0 = scmp.lt.u32.totalorder %s3886_s23, %s3881_s19 }
  0xc4   : > { %p3890_p5 = scmp.lt.u32.totalorder %s3881_s19, %s4324_s15 }
  0xc5   : > { %p3884_p1 = pnand %p3883_p8, %p3882_p12  ;;  %p3889_p2 = por %p3888_p0, %p3887_p13 }
  0xc7   : > { %p3885_p3 = pneg %p3884_p1  ;;  %p3891_p7 = por %p3890_p5, %p3889_p2 }
  0xc9   : > { %p3892_p9 = pnand %p3891_p7, %p3885_p3 }
  0xcb   : > { %3895 = shalt.err (!%p3892_p9)
}
  0xcc   : > { %s3896_s25 = scalar_lea.vmem %s4327_s28, 1024  ;;  %s4037_s26 = smov [#allocation3]  }
  0xcd   : > { %p3897_p12 = scmp.ne.s32.totalorder %s4327_s28, %s3896_s25  ;;  %s3901_s22 = sshll.u32 %s4037_s26, 4  ;;  %s3902_s22 = int_to_ptr.vmem [resolvable:$false] %s3901_s22 }
  0xce   : > { %s3903_s2 = scalar_lea.vmem %s3902_s22, 2048  ;;  %p3904_p4 = scmp.lt.s32.totalorder %s4327_s28, %s3902_s22 }
  0xcf   : > { %p3899_p1 = pnand %p3897_p12, %p3883_p8  ;;  %p3905_p13 = scmp.lt.s32.totalorder %s3903_s2, %s3896_s25 }
  0xd1   : > { %p3900_p10 = pneg %p3899_p1  ;;  %p3906_p0 = por %p3905_p13, %p3904_p4 }
  0xd3   : > { %p3907_p2 = pnand %p3906_p0, %p3900_p10 }
  0xd5   : > { %3910 = shalt.err (!%p3907_p2)
}
  0xd6   : > { %s4038_s10 = smov 64   ;;  %s4039_s19 = smov 4  }
  0xd7   : > { %3429 = dma.hbm_to_vmem [thread:$0]  (!%p4331_p11), %s4324_s15, 1024, %s4327_s28, %s4335_s24, %s4038_s10, %s4038_s10, %s4039_s19  }
  0xd8   : > { %s5026_s23 = sshll.u32 %s4027_s14, 10  ;;  %s373_s2 = scalar_lea.vmem [#allocation6], %s4316_s30 }
  0xd9   : > { %s4371_s22 = scalar_lea.hbm %s4992_s1, %s5026_s23  ;;  %s380_s0 = sshll.u32 %s373_s2, 4  ;;  %s4374_s0 = int_to_ptr.vmem [resolvable:$true] %s380_s0 }
  0xda   : > { %s369_s3 = sand.u32 1, %s4027_s14   ;;  %s3911_s5 = scalar_lea.hbm %s4371_s22, 1024 }
  0xdb   : > { %s4377_s4 = scalar_lea.sflag [#allocation7], %s369_s3  ;;  %p3912_p4 = scmp.ne.s32.totalorder %s4371_s22, %s3911_s5 }
  0xdc   : > { %s3916_s24 = scalar_lea.hbm %s4992_s1, 2048  ;;  %p3917_p5 = scmp.lt.u32.totalorder %s4371_s22, %s4992_s1 }
  0xdd   : > { %p3914_p10 = pnand %p3912_p4, %p3883_p8  ;;  %p3918_p7 = scmp.lt.u32.totalorder %s3916_s24, %s3911_s5 }
  0xde   : > { %p3920_p12 = scmp.lt.u32.totalorder %s3911_s5, %s4371_s22 }
  0xdf   : > { %p3915_p3 = pneg %p3914_p10  ;;  %p3919_p9 = por %p3918_p7, %p3917_p5 }
  0xe1   : > { %p3921_p1 = por %p3920_p12, %p3919_p9 }
  0xe3   : > { %p3922_p13 = pnand %p3921_p1, %p3915_p3 }
  0xe5   : > { %3925 = shalt.err (!%p3922_p13)
}
  0xe6   : > { %s3926_s3 = scalar_lea.vmem %s4374_s0, 1024  ;;  %s4040_s30 = smov [#allocation6]  }
  0xe7   : > { %p3927_p0 = scmp.ne.s32.totalorder %s4374_s0, %s3926_s3  ;;  %s3931_s26 = sshll.u32 %s4040_s30, 4  ;;  %s3932_s26 = int_to_ptr.vmem [resolvable:$false] %s3931_s26 }
  0xe8   : > { %s3933_s2 = scalar_lea.vmem %s3932_s26, 2048  ;;  %p3934_p10 = scmp.lt.s32.totalorder %s4374_s0, %s3932_s26 }
  0xe9   : > { %p3929_p2 = pnand %p3927_p0, %p3883_p8  ;;  %p3935_p5 = scmp.lt.s32.totalorder %s3933_s2, %s3926_s3 }
  0xeb   : > { %p3930_p4 = pneg %p3929_p2  ;;  %p3936_p7 = por %p3935_p5, %p3934_p10 }
  0xed   : > { %p3937_p9 = pnand %p3936_p7, %p3930_p4 }
  0xef   : > { %3940 = shalt.err (!%p3937_p9)
}
  0xf0   : > { %3432 = dma.hbm_to_vmem [thread:$0]  (!%p4331_p11), %s4371_s22, 1024, %s4374_s0, %s4377_s4, %s4038_s10, %s4038_s10, %s4039_s19  }
  0xf1   : > { %p5027_p8 = scmp.ne.s32.totalorder %s5011_s17, 0 }
  0xf2   : > { %s4409_s5 = sand.u32 (!%p5027_p8), 1, %s4019_s12  }
  0xf3   : > { %392 = sbr.rel (%p5027_p8) target bundleno = 1001 (0x3e9), region = 56  ;;  %s3049_s15 = sshll.u32 (!%p5027_p8), %s4409_s5, 6 }
  0xf4   : > { %s395_s28 = scalar_lea.sflag (!%p5027_p8), [#allocation4], %s4409_s5  ;;  %s4413_s24 = scalar_lea.vmem (!%p5027_p8), [#allocation3], %s3049_s15 }
  0xfa   : > { %3986 = dma.done.wait (%p4301_p6), %s395_s28, 1024  }
  0xfb   : > { %3988 = vsyncadd (%p4301_p6), %s395_s28, 4294966272  ;;  %s403_s0 = sand.u32 1, %s4121_s16   ;;  %s4420_s17 = scalar_lea.vmem [#allocation6], %s3049_s15 }
  0xfc   : > { %s404_s4 = scalar_lea.sflag [#allocation7], %s403_s0 }
  0xfd   : > { %3990 = dma.done.wait (%p4301_p6), %s404_s4, 1024  }
  0xfe   : > { %3992 = vsyncadd (%p4301_p6), %s404_s4, 4294966272  ;;  %p5028_p11 = scmp.eq.s32.totalorder %s4121_s16, 0 }
 0x100   : > { %3994 = dma.done.wait (%p5028_p11), [#allocation7], 512   ;;  %p5029_p3 = pmov %p5028_p11 }
 0x102   : > { %3996 = vsyncadd (%p5029_p3), [#allocation7], 4294966784  ;;  %p5030_p12 = pmov %p5029_p3 }
 0x103   : > { %p5031_p1 = pmov %p5029_p3 }
 0x104   : > { %3998 = dma.done.wait (%p5030_p12), [#allocation10], 16448  }
 0x105   : > { %4000 = vsyncadd (%p5031_p1), [#allocation10], 4294950848  ;;  %p5032_p13 = pmov %p5031_p1 }
 0x106   : > { %p5033_p0 = pmov %p5031_p1 }
 0x107   : > { %4002 = dma.done.wait (%p5032_p13), [#allocation13], 192  }
 0x108   : > { %4004 = vsyncadd (%p5033_p0), [#allocation13], 4294967104  ;;  %p5034_p6 = pmov %p5033_p0 }
 0x109   : > { %p5035_p2 = pmov %p5033_p0 }
 0x10a   : > { %4006 = dma.done.wait (%p5034_p6), [#allocation16], 64  }
 0x10b   : > { %4008 = vsyncadd (%p5035_p2), [#allocation16], 4294967232  ;;  %v4041_v0 = vmov 0   ;;  %v851_v1 = vlaneseq  ;;  %v4042_v2 = vmov 1983009808   ;;  %v3501_v6 = vld [vmem:[%s4413_s24] sm:$0xff]  }
 0x10c   : > { %612 = vmatprep.mubr.bf16.mxu0 %v4041_v0  ;;  %725 = vmatprep.mubr.bf16.mxu1 %v4041_v0  ;;  %v1144_v3 = vunpack.c.l.s4 %v4042_v2  ;;  %v3498_v4 = vld [vmem:[#allocation8 + $0x4] ss:$16 sps:$4 sm:$0xff]   ;;  %v3500_v5 = vld [vmem:[#allocation8] ss:$16 sps:$4 sm:$0xff]   ;;  %vm555_vm0 = vcmask 130048   ;;  %v3502_v10 = vld [vmem:[%s4413_s24 + $0x8] sm:$0xff]  }
 0x10d   : > { %580 = vmatprep.subr.bf16.mxu0 %v3498_v4  ;;  %v4445_v7 = vshrl.u32 %v851_v1, 7  ;;  %v3509_v11 = vld [vmem:[#allocation8 + $0xc] ss:$16 sps:$4 sm:$0xff]   ;;  %v3511_v12 = vld [vmem:[#allocation8 + $0x8] ss:$16 sps:$4 sm:$0xff]   ;;  %vm1184_vm1 = vcmask 1041408  }
 0x10e   : > { %581 = vmatpush1.bf16.msra.mxu0 %v3500_v5  ;;  %v1145_v8 = vunpack.c.0.s8 %v1144_v3  ;;  %v1100_v13 = vld [vmem:[#allocation12] sm:$0xff]  ;;  %693 = vmatprep.subr.bf16.mxu1 %v3509_v11  ;;  %v3519_v22 = vld [vmem:[#allocation11 + $0xc] ss:$16 sps:$4 sm:$0xff]   ;;  %v3504_v24 = vld [vmem:[%s4413_s24 + $0x18] sm:$0xff]   ;;  %vm1159_vm2 = vcmask 31744   ;;  %s2831_s8 = sld [smem:[#allocation2]] }
 0x10f   : > { %v1142_v15 = vcombine.high %v1100_v13, %v1100_v13  ;;  %694 = vmatpush1.bf16.msra.mxu1 %v3511_v12  ;;  %v3515_v17 = vld [vmem:[#allocation11 + $0x4] ss:$16 sps:$4 sm:$0xff]   ;;  %v3503_v23 = vld [vmem:[%s4413_s24 + $0x10] sm:$0xff]   ;;  %v3505_v25 = vld [vmem:[%s4413_s24 + $0x20] sm:$0xff]   ;;  %s3057_s18 = sshll.u32 %s4409_s5, 7  ;;  %vm2849_vm3 = vcmask 7168  }
 0x110   : > { %v1148_v9 = vsub.s32 %v1145_v8, %v4445_v7  ;;  %v3506_v26 = vld [vmem:[%s4413_s24 + $0x28] sm:$0xff]   ;;  %v3507_v27 = vld [vmem:[%s4413_s24 + $0x30] sm:$0xff]   ;;  %v3508_v28 = vld [vmem:[%s4413_s24 + $0x38] sm:$0xff]   ;;  %s4906_s10 = scalar_lea.vmem [#allocation17], %s3057_s18  ;;  %s3248_s19 = sshll.u32 %s4121_s16, 11 }
 0x111   : > { %3070 = vmatmul.mubr.msk.bf16.vlgmr.msra.gmra.mrb[0].mxu0 %vm555_vm0, %v3501_v6  ;;  %v3516_v29 = vld [vmem:[%s4420_s17] sm:$0xff]   ;;  %v3522_v31 = vld [vmem:[#allocation11 + $0x24] ss:$16 sps:$4 sm:$0xff]   ;;  %v3517_v37 = vld [vmem:[#allocation11 + $0x8] ss:$16 sps:$4 sm:$0xff]   ;;  %s2880_s22 = sshll.u32 %s4906_s10, 4  ;;  %s4941_s3 = scalar_lea.hbm %s5000_s9, %s3248_s19  ;;  %s4943_s22 = int_to_ptr.vmem [resolvable:$true] %s2880_s22 }
 0x112   : > { %622 = vmatprep.mubr.bf16.mxu0 %v4041_v0  ;;  %v1149_v14 = vrot.slane %v1100_v13, %v1148_v9  ;;  %v1156_v19 = vrot.slane %v1142_v15, %v1148_v9  ;;  %3078 = vmatmul.mubr.msk.bf16.vlgmr.msra.gmra.mrb[0].mxu1 %vm555_vm0, %v3501_v6  ;;  %v3513_v30 = vld [vmem:[#allocation11] ss:$16 sps:$4 sm:$0xff]   ;;  %v3528_v33 = vld [vmem:[#allocation11 + $0x44] ss:$16 sps:$4 sm:$0xff]   ;;  %v3525_v38 = vld [vmem:[#allocation11 + $0x2c] ss:$16 sps:$4 sm:$0xff]  }
 0x113   : > { %735 = vmatprep.mubr.bf16.mxu1 %v4041_v0  ;;  %v3520_v32 = vld [vmem:[#allocation11 + $0x20] ss:$16 sps:$4 sm:$0xff]   ;;  %v3529_v34 = vld [vmem:[%s4420_s17 + $0x8] sm:$0xff]   ;;  %v3532_v42 = vld [vmem:[#allocation11 + $0x4c] ss:$16 sps:$4 sm:$0xff]   ;;  %s2867_s16 = scalar_lea.sflag [#allocation5], %s4409_s5 }
 0x114   : > { %v1157_v16 = vcombine.high %v1149_v14, %v1149_v14  ;;  %v1186_v18 = vsel %vm1184_vm1, %v1149_v14, 0  ;;  %v1158_v20 = vcombine.high %v1156_v19, %v1156_v19  ;;  %v1192_v21 = vsel %vm1184_vm1, %v1156_v19, 0  ;;  %v3526_v35 = vld [vmem:[#allocation11 + $0x40] ss:$16 sps:$4 sm:$0xff]   ;;  %v3535_v36 = vld [vmem:[#allocation11 + $0x64] ss:$16 sps:$4 sm:$0xff]  }
 0x115   : > { %v3533_v39 = vld [vmem:[#allocation11 + $0x60] ss:$16 sps:$4 sm:$0xff]   ;;  %v3541_v40 = vld [vmem:[#allocation11 + $0x84] ss:$16 sps:$4 sm:$0xff]   ;;  %v3523_v41 = vld [vmem:[#allocation11 + $0x28] ss:$16 sps:$4 sm:$0xff]  }
 0x116   : > { %3095 = vmatprep.subr.msk.bf16.mxu0 %vm1184_vm1, %v1157_v16  ;;  %3104 = vmatprep.subr.msk.bf16.mxu1 %vm1184_vm1, %v1158_v20  ;;  %v3542_v43 = vld [vmem:[%s4420_s17 + $0x10] sm:$0xff]   ;;  %v3548_v45 = vld [vmem:[#allocation11 + $0xa4] ss:$16 sps:$4 sm:$0xff]   ;;  %v3530_v46 = vld [vmem:[#allocation11 + $0x48] ss:$16 sps:$4 sm:$0xff]   ;;  %s3941_s30 = scalar_lea.vmem %s4943_s22, 2048 }
 0x117   : > { %1198 = vmatpush1.bf16.msra.mxu0 %v1186_v18  ;;  %1311 = vmatpush1.bf16.msra.mxu1 %v1192_v21  ;;  %v3539_v44 = vld [vmem:[#allocation11 + $0x80] ss:$16 sps:$4 sm:$0xff]   ;;  %v3538_v47 = vld [vmem:[#allocation11 + $0x6c] ss:$16 sps:$4 sm:$0xff]   ;;  %v3554_v49 = vld [vmem:[#allocation11 + $0xc4] ss:$16 sps:$4 sm:$0xff]   ;;  %p3942_p4 = scmp.ne.s32.totalorder %s4943_s22, %s3941_s30 }
 0x118   : > { %2063 = vmatprep.subr.bf16.mxu0 %v3515_v17  ;;  %2289 = vmatprep.subr.bf16.mxu1 %v3519_v22  ;;  %v3546_v48 = vld [vmem:[#allocation11 + $0xa0] ss:$16 sps:$4 sm:$0xff]   ;;  %v3536_v50 = vld [vmem:[#allocation11 + $0x68] ss:$16 sps:$4 sm:$0xff]   ;;  %v3545_v51 = vld [vmem:[#allocation11 + $0x8c] ss:$16 sps:$4 sm:$0xff]  }
 0x119   : > { %3071 = vmatmul.mubr.msk.bf16.gmra.mrb[4].mxu0 %vm555_vm0, %v3502_v10  ;;  %v3555_v52 = vld [vmem:[%s4420_s17 + $0x18] sm:$0xff]   ;;  %v3552_v53 = vld [vmem:[#allocation11 + $0xc0] ss:$16 sps:$4 sm:$0xff]   ;;  %v3551_v56 = vld [vmem:[#allocation11 + $0xac] ss:$16 sps:$4 sm:$0xff]   ;;  %p5036_p10 = scmp.ne.s32.totalorder %s5022_s27, 0 }
 0x11a   : > { %632 = vmatprep.mubr.bf16.mxu0 %v4041_v0  ;;  %3079 = vmatmul.mubr.msk.bf16.gmra.mrb[4].mxu1 %vm555_vm0, %v3502_v10  ;;  %v3561_v54 = vld [vmem:[#allocation11 + $0xe4] ss:$16 sps:$4 sm:$0xff]   ;;  %v3543_v55 = vld [vmem:[#allocation11 + $0x88] ss:$16 sps:$4 sm:$0xff]   ;;  %v3559_v57 = vld [vmem:[#allocation11 + $0xe0] ss:$16 sps:$4 sm:$0xff]  }
 0x11b   : > { %745 = vmatprep.mubr.bf16.mxu1 %v4041_v0  ;;  %v3567_v58 = vld [vmem:[#allocation11 + $0x104] ss:$16 sps:$4 sm:$0xff]   ;;  %v3549_v59 = vld [vmem:[#allocation11 + $0xa8] ss:$16 sps:$4 sm:$0xff]   ;;  %v3558_v60 = vld [vmem:[#allocation11 + $0xcc] ss:$16 sps:$4 sm:$0xff]   ;;  %p3943_p5 = pnand %p3942_p4, %p5036_p10 }
 0x11c   : > { %v3568_v61 = vld [vmem:[%s4420_s17 + $0x20] sm:$0xff]   ;;  %v3574_v63 = vld [vmem:[#allocation11 + $0x124] ss:$16 sps:$4 sm:$0xff]   ;;  %v3556_v1 = vld [vmem:[#allocation11 + $0xc8] ss:$16 sps:$4 sm:$0xff]   ;;  %s4044_s26 = smov [#allocation17]  }
 0x11d   : > { %v3565_v62 = vld [vmem:[#allocation11 + $0x100] ss:$16 sps:$4 sm:$0xff]   ;;  %v3564_v2 = vld [vmem:[#allocation11 + $0xec] ss:$16 sps:$4 sm:$0xff]   ;;  %v3580_v4 = vld [vmem:[#allocation11 + $0x144] ss:$16 sps:$4 sm:$0xff]   ;;  %p3944_p7 = pneg %p3943_p5 }
 0x11e   : > { %v3572_v3 = vld [vmem:[#allocation11 + $0x120] ss:$16 sps:$4 sm:$0xff]   ;;  %v3562_v5 = vld [vmem:[#allocation11 + $0xe8] ss:$16 sps:$4 sm:$0xff]   ;;  %v3571_v6 = vld [vmem:[#allocation11 + $0x10c] ss:$16 sps:$4 sm:$0xff]  }
 0x11f   : > { %v3581_v8 = vld [vmem:[%s4420_s17 + $0x28] sm:$0xff]   ;;  %v3578_v9 = vld [vmem:[#allocation11 + $0x140] ss:$16 sps:$4 sm:$0xff]   ;;  %v3577_v12 = vld [vmem:[#allocation11 + $0x12c] ss:$16 sps:$4 sm:$0xff]   ;;  %s3945_s2 = sshll.u32 %s4044_s26, 4  ;;  %s3946_s2 = int_to_ptr.vmem [resolvable:$false] %s3945_s2 }
 0x120   : > { %v3587_v10 = vld [vmem:[#allocation11 + $0x164] ss:$16 sps:$4 sm:$0xff]   ;;  %v3569_v11 = vld [vmem:[#allocation11 + $0x108] ss:$16 sps:$4 sm:$0xff]   ;;  %v3585_v13 = vld [vmem:[#allocation11 + $0x160] ss:$16 sps:$4 sm:$0xff]   ;;  %p3948_p9 = scmp.lt.s32.totalorder %s4943_s22, %s3946_s2 }
 0x121   : > { %3072 = vmatmul.mubr.msk.bf16.gmra.mrb[8].mxu0 %vm555_vm0, %v3503_v23  ;;  %v3593_v14 = vld [vmem:[#allocation11 + $0x184] ss:$16 sps:$4 sm:$0xff]   ;;  %v3575_v15 = vld [vmem:[#allocation11 + $0x128] ss:$16 sps:$4 sm:$0xff]   ;;  %v3584_v16 = vld [vmem:[#allocation11 + $0x14c] ss:$16 sps:$4 sm:$0xff]  }
 0x122   : > { %642 = vmatprep.mubr.bf16.mxu0 %v4041_v0  ;;  %3080 = vmatmul.mubr.msk.bf16.gmra.mrb[8].mxu1 %vm555_vm0, %v3503_v23  ;;  %v3594_v17 = vld [vmem:[%s4420_s17 + $0x30] sm:$0xff]   ;;  %v3600_v19 = vld [vmem:[#allocation11 + $0x1a4] ss:$16 sps:$4 sm:$0xff]   ;;  %v3582_v20 = vld [vmem:[#allocation11 + $0x148] ss:$16 sps:$4 sm:$0xff]   ;;  %s3947_s15 = scalar_lea.vmem %s3946_s2, 4096 }
 0x123   : > { %755 = vmatprep.mubr.bf16.mxu1 %v4041_v0  ;;  %v3591_v18 = vld [vmem:[#allocation11 + $0x180] ss:$16 sps:$4 sm:$0xff]   ;;  %v3590_v21 = vld [vmem:[#allocation11 + $0x16c] ss:$16 sps:$4 sm:$0xff]   ;;  %v3606_v23 = vld [vmem:[#allocation11 + $0x1c4] ss:$16 sps:$4 sm:$0xff]   ;;  %p3949_p8 = scmp.lt.s32.totalorder %s3947_s15, %s3941_s30 }
 0x124   : > { %v3598_v22 = vld [vmem:[#allocation11 + $0x1a0] ss:$16 sps:$4 sm:$0xff]  }
 0x125   : > { %p3950_p11 = por %p3949_p8, %p3948_p9 }
 0x127   : > { %p3951_p3 = pnand %p3950_p11, %p3944_p7 }
 0x129   : > { %3073 = vmatmul.mubr.msk.bf16.gmra.mrb[12].mxu0 %vm555_vm0, %v3504_v24 }
 0x12a   : > { %652 = vmatprep.mubr.bf16.mxu0 %v4041_v0  ;;  %3081 = vmatmul.mubr.msk.bf16.gmra.mrb[12].mxu1 %vm555_vm0, %v3504_v24  ;;  %v3588_v24 = vld [vmem:[#allocation11 + $0x168] ss:$16 sps:$4 sm:$0xff]  }
 0x12b   : > { %765 = vmatprep.mubr.bf16.mxu1 %v4041_v0 }
 0x131   : > { %3074 = vmatmul.mubr.msk.bf16.gmra.mrb[16].mxu0 %vm555_vm0, %v3505_v25 }
 0x132   : > { %662 = vmatprep.mubr.bf16.mxu0 %v4041_v0  ;;  %3082 = vmatmul.mubr.msk.bf16.gmra.mrb[16].mxu1 %vm555_vm0, %v3505_v25  ;;  %v3597_v25 = vld [vmem:[#allocation11 + $0x18c] ss:$16 sps:$4 sm:$0xff]  }
 0x133   : > { %775 = vmatprep.mubr.bf16.mxu1 %v4041_v0 }
 0x139   : > { %3075 = vmatmul.mubr.msk.bf16.gmra.mrb[20].mxu0 %vm555_vm0, %v3506_v26 }
 0x13a   : > { %672 = vmatprep.mubr.bf16.mxu0 %v4041_v0  ;;  %3083 = vmatmul.mubr.msk.bf16.gmra.mrb[20].mxu1 %vm555_vm0, %v3506_v26  ;;  %v3607_v26 = vld [vmem:[%s4420_s17 + $0x38] sm:$0xff]  }
 0x13b   : > { %785 = vmatprep.mubr.bf16.mxu1 %v4041_v0 }
 0x141   : > { %3076 = vmatmul.mubr.msk.bf16.gmra.mrb[24].mxu0 %vm555_vm0, %v3507_v27 }
 0x142   : > { %682 = vmatprep.mubr.bf16.mxu0 %v4041_v0  ;;  %3084 = vmatmul.mubr.msk.bf16.gmra.mrb[24].mxu1 %vm555_vm0, %v3507_v27  ;;  %v3604_v27 = vld [vmem:[#allocation11 + $0x1c0] ss:$16 sps:$4 sm:$0xff]  }
 0x143   : > { %795 = vmatprep.mubr.bf16.mxu1 %v4041_v0 }
 0x149   : > { %3077 = vmatmul.mubr.msk.bf16.gmra.mrb[28].mxu0 %vm555_vm0, %v3508_v28 }
 0x14a   : > { %1229 = vmatprep.mubr.bf16.mxu0 %v4041_v0  ;;  %3085 = vmatmul.mubr.msk.bf16.gmra.mrb[28].mxu1 %vm555_vm0, %v3508_v28  ;;  %v3613_v28 = vld [vmem:[#allocation11 + $0x1e4] ss:$16 sps:$4 sm:$0xff]  }
 0x14b   : > { %1342 = vmatprep.mubr.bf16.mxu1 %v4041_v0 }
 0x151   : > { %3096 = vmatmul.mubr.msk.bf16.vlgmr.msra.gmra.mrb[32].mxu0 %vm1159_vm2, %v3516_v29 }
 0x152   : > { %2064 = vmatpush1.bf16.msra.mxu0 %v3513_v30  ;;  %1239 = vmatprep.mubr.bf16.mxu0 %v4041_v0  ;;  %v3603_v30 = vld [vmem:[#allocation11 + $0x1ac] ss:$16 sps:$4 sm:$0xff]  }
 0x153   : > { %2065 = vmatprep.subr.bf16.mxu0 %v3522_v31  ;;  %3105 = vmatmul.mubr.msk.bf16.vlgmr.msra.gmra.mrb[32].mxu1 %vm1159_vm2, %v3516_v29  ;;  %v3595_v29 = vld [vmem:[#allocation11 + $0x188] ss:$16 sps:$4 sm:$0xff]   ;;  %v3611_v31 = vld [vmem:[#allocation11 + $0x1e0] ss:$16 sps:$4 sm:$0xff]  }
 0x154   : > { %2290 = vmatpush1.bf16.msra.mxu1 %v3517_v37  ;;  %1352 = vmatprep.mubr.bf16.mxu1 %v4041_v0  ;;  %v3614_v37 = vld [vmem:[#allocation11 + $0x1e8] ss:$16 sps:$4 sm:$0xff]  }
 0x155   : > { %2291 = vmatprep.subr.bf16.mxu1 %v3525_v38  ;;  %v3622_v38 = vld [vmem:[#allocation11 + $0x20c] ss:$16 sps:$4 sm:$0xff]  }
 0x156   : > { %2066 = vmatpush1.bf16.msra.mxu0 %v3520_v32  ;;  %v3619_v32 = vld [vmem:[#allocation11 + $0x204] ss:$16 sps:$4 sm:$0xff]  }
 0x157   : > { %2067 = vmatprep.subr.bf16.mxu0 %v3528_v33  ;;  %v3601_v33 = vld [vmem:[#allocation11 + $0x1a8] ss:$16 sps:$4 sm:$0xff]  }
 0x158   : > { %2292 = vmatpush1.bf16.msra.mxu1 %v3523_v41 }
 0x159   : > { %3097 = vmatmul.mubr.msk.bf16.gmra.mrb[36].mxu0 %vm1159_vm2, %v3529_v34  ;;  %2293 = vmatprep.subr.bf16.mxu1 %v3532_v42  ;;  %v3086_v42 = vld.sshfl [vmem:[#allocation9] sm:$0x33 pattern:$0x75316420] }
 0x15a   : > { %2068 = vmatpush1.bf16.msra.mxu0 %v3526_v35  ;;  %1249 = vmatprep.mubr.bf16.mxu0 %v4041_v0  ;;  %v3608_v35 = vld [vmem:[#allocation11 + $0x1c8] ss:$16 sps:$4 sm:$0xff]  }
 0x15b   : > { %2069 = vmatprep.subr.bf16.mxu0 %v3535_v36  ;;  %3106 = vmatmul.mubr.msk.bf16.gmra.mrb[36].mxu1 %vm1159_vm2, %v3529_v34  ;;  %v3610_v34 = vld [vmem:[#allocation11 + $0x1cc] ss:$16 sps:$4 sm:$0xff]  }
 0x15c   : > { %2294 = vmatpush1.bf16.msra.mxu1 %v3530_v46  ;;  %1362 = vmatprep.mubr.bf16.mxu1 %v4041_v0  ;;  %v3616_v36 = vld [vmem:[#allocation11 + $0x1ec] ss:$16 sps:$4 sm:$0xff]  }
 0x15d   : > { %2295 = vmatprep.subr.bf16.mxu1 %v3538_v47  ;;  %v4535_v47 = vsub.s32 0, %v4445_v7 }
 0x15e   : > { %2070 = vmatpush1.bf16.msra.mxu0 %v3533_v39  ;;  %v4043_v39 = vmov 1966171168  }
 0x15f   : > { %2071 = vmatprep.subr.bf16.mxu0 %v3541_v40  ;;  %v849_v40 = vunpack.c.l.s4 %v4043_v39 }
 0x160   : > { %2296 = vmatpush1.bf16.msra.mxu1 %v3536_v50 }
 0x161   : > { %3098 = vmatmul.mubr.msk.bf16.gmra.mrb[40].mxu0 %vm1159_vm2, %v3542_v43  ;;  %2297 = vmatprep.subr.bf16.mxu1 %v3545_v51  ;;  %v850_v41 = vunpack.c.0.s8 %v849_v40  ;;  %v3643_v40 = vld [vmem:[#allocation11 + $0x284] ss:$16 sps:$4 sm:$0xff]  }
 0x162   : > { %2072 = vmatpush1.bf16.msra.mxu0 %v3539_v44  ;;  %1259 = vmatprep.mubr.bf16.mxu0 %v4041_v0  ;;  %v847_v44 = vcombine.high %v3086_v42, %v3086_v42 }
 0x163   : > { %2073 = vmatprep.subr.bf16.mxu0 %v3548_v45  ;;  %3107 = vmatmul.mubr.msk.bf16.gmra.mrb[40].mxu1 %vm1159_vm2, %v3542_v43  ;;  %v853_v43 = vsub.s32 %v850_v41, %v4445_v7  ;;  %v3646_v41 = vld [vmem:[#allocation11 + $0x28c] ss:$16 sps:$4 sm:$0xff]  }
 0x164   : > { %2298 = vmatpush1.bf16.msra.mxu1 %v3543_v55  ;;  %1372 = vmatprep.mubr.bf16.mxu1 %v4041_v0 }
 0x165   : > { %2299 = vmatprep.subr.bf16.mxu1 %v3551_v56  ;;  %v4530_v45 = vrot.slane %v3086_v42, %v853_v43  ;;  %v4532_v46 = vrot.slane %v847_v44, %v853_v43 }
 0x166   : > { %2074 = vmatpush1.bf16.msra.mxu0 %v3546_v48 }
 0x167   : > { %2075 = vmatprep.subr.bf16.mxu0 %v3554_v49  ;;  %v865_v48 = vpack.i.b16 %v4530_v45, %v4530_v45  ;;  %v872_v49 = vpack.i.b16 %v4532_v46, %v4532_v46 }
 0x168   : > { %2300 = vmatpush1.bf16.msra.mxu1 %v3549_v59 }
 0x169   : > { %3099 = vmatmul.mubr.msk.bf16.gmra.mrb[44].mxu0 %vm1159_vm2, %v3555_v52  ;;  %2301 = vmatprep.subr.bf16.mxu1 %v3558_v60 }
 0x16a   : > { %2076 = vmatpush1.bf16.msra.mxu0 %v3552_v53  ;;  %1269 = vmatprep.mubr.bf16.mxu0 %v4041_v0 }
 0x16b   : > { %2077 = vmatprep.subr.bf16.mxu0 %v3561_v54  ;;  %3108 = vmatmul.mubr.msk.bf16.gmra.mrb[44].mxu1 %vm1159_vm2, %v3555_v52  ;;  %v4542_v52 = vrot.slane %v865_v48, %v4535_v47  ;;  %v4545_v54 = vrot.slane %v872_v49, %v4535_v47 }
 0x16c   : > { %2302 = vmatpush1.bf16.msra.mxu1 %v3556_v1  ;;  %1382 = vmatprep.mubr.bf16.mxu1 %v4041_v0 }
 0x16d   : > { %2303 = vmatprep.subr.bf16.mxu1 %v3564_v2 }
 0x16e   : > { %2078 = vmatpush1.bf16.msra.mxu0 %v3559_v57 }
 0x16f   : > { %2079 = vmatprep.subr.bf16.mxu0 %v3567_v58 }
 0x170   : > { %2304 = vmatpush1.bf16.msra.mxu1 %v3562_v5 }
 0x171   : > { %3100 = vmatmul.mubr.msk.bf16.gmra.mrb[48].mxu0 %vm1159_vm2, %v3568_v61  ;;  %2305 = vmatprep.subr.bf16.mxu1 %v3571_v6 }
 0x172   : > { %2080 = vmatpush1.bf16.msra.mxu0 %v3565_v62  ;;  %1279 = vmatprep.mubr.bf16.mxu0 %v4041_v0  ;;  %v3617_v62 = vld [vmem:[#allocation11 + $0x200] ss:$16 sps:$4 sm:$0xff]  }
 0x173   : > { %2081 = vmatprep.subr.bf16.mxu0 %v3574_v63  ;;  %3109 = vmatmul.mubr.msk.bf16.gmra.mrb[48].mxu1 %vm1159_vm2, %v3568_v61  ;;  %v3620_v63 = vld [vmem:[#allocation11 + $0x208] ss:$16 sps:$4 sm:$0xff]  }
 0x174   : > { %2306 = vmatpush1.bf16.msra.mxu1 %v3569_v11  ;;  %1392 = vmatprep.mubr.bf16.mxu1 %v4041_v0 }
 0x175   : > { %2307 = vmatprep.subr.bf16.mxu1 %v3577_v12  ;;  %v3623_v12 = vld [vmem:[#allocation11 + $0x220] ss:$16 sps:$4 sm:$0xff]  }
 0x176   : > { %2082 = vmatpush1.bf16.msra.mxu0 %v3572_v3  ;;  %v3625_v3 = vld [vmem:[#allocation11 + $0x224] ss:$16 sps:$4 sm:$0xff]  }
 0x177   : > { %2083 = vmatprep.subr.bf16.mxu0 %v3580_v4  ;;  %v3628_v4 = vld [vmem:[#allocation11 + $0x22c] ss:$16 sps:$4 sm:$0xff]  }
 0x178   : > { %2308 = vmatpush1.bf16.msra.mxu1 %v3575_v15 }
 0x179   : > { %3101 = vmatmul.mubr.msk.bf16.gmra.mrb[52].mxu0 %vm1159_vm2, %v3581_v8  ;;  %2309 = vmatprep.subr.bf16.mxu1 %v3584_v16  ;;  %v3631_v16 = vld [vmem:[#allocation11 + $0x244] ss:$16 sps:$4 sm:$0xff]  }
 0x17a   : > { %2084 = vmatpush1.bf16.msra.mxu0 %v3578_v9  ;;  %1289 = vmatprep.mubr.bf16.mxu0 %v4041_v0 }
 0x17b   : > { %2085 = vmatprep.subr.bf16.mxu0 %v3587_v10  ;;  %3110 = vmatmul.mubr.msk.bf16.gmra.mrb[52].mxu1 %vm1159_vm2, %v3581_v8 }
 0x17c   : > { %2310 = vmatpush1.bf16.msra.mxu1 %v3582_v20  ;;  %1402 = vmatprep.mubr.bf16.mxu1 %v4041_v0 }
 0x17d   : > { %2311 = vmatprep.subr.bf16.mxu1 %v3590_v21 }
 0x17e   : > { %2086 = vmatpush1.bf16.msra.mxu0 %v3585_v13  ;;  %v3626_v13 = vld [vmem:[#allocation11 + $0x228] ss:$16 sps:$4 sm:$0xff]  }
 0x17f   : > { %2087 = vmatprep.subr.bf16.mxu0 %v3593_v14 }
 0x180   : > { %2312 = vmatpush1.bf16.msra.mxu1 %v3588_v24  ;;  %v3629_v24 = vld [vmem:[#allocation11 + $0x240] ss:$16 sps:$4 sm:$0xff]  }
 0x181   : > { %3102 = vmatmul.mubr.msk.bf16.gmra.mrb[56].mxu0 %vm1159_vm2, %v3594_v17  ;;  %2313 = vmatprep.subr.bf16.mxu1 %v3597_v25  ;;  %v3632_v25 = vld [vmem:[#allocation11 + $0x248] ss:$16 sps:$4 sm:$0xff]  }
 0x182   : > { %2088 = vmatpush1.bf16.msra.mxu0 %v3591_v18  ;;  %1299 = vmatprep.mubr.bf16.mxu0 %v4041_v0 }
 0x183   : > { %2089 = vmatprep.subr.bf16.mxu0 %v3600_v19  ;;  %3111 = vmatmul.mubr.msk.bf16.gmra.mrb[56].mxu1 %vm1159_vm2, %v3594_v17  ;;  %v3634_v17 = vld [vmem:[#allocation11 + $0x24c] ss:$16 sps:$4 sm:$0xff]  }
 0x184   : > { %2314 = vmatpush1.bf16.msra.mxu1 %v3595_v29  ;;  %1412 = vmatprep.mubr.bf16.mxu1 %v4041_v0  ;;  %v3640_v29 = vld [vmem:[#allocation11 + $0x26c] ss:$16 sps:$4 sm:$0xff]  }
 0x185   : > { %2315 = vmatprep.subr.bf16.mxu1 %v3603_v30 }
 0x186   : > { %2090 = vmatpush1.bf16.msra.mxu0 %v3598_v22 }
 0x187   : > { %2091 = vmatprep.subr.bf16.mxu0 %v3606_v23 }
 0x188   : > { %2316 = vmatpush1.bf16.msra.mxu1 %v3601_v33 }
 0x189   : > { %3103 = vmatmul.mubr.msk.bf16.gmra.mrb[60].mxu0 %vm1159_vm2, %v3607_v26  ;;  %2317 = vmatprep.subr.bf16.mxu1 %v3610_v34 }
 0x18a   : > { %2092 = vmatpush1.bf16.msra.mxu0 %v3604_v27 }
 0x18b   : > { %2093 = vmatprep.subr.bf16.mxu0 %v3613_v28  ;;  %3112 = vmatmul.mubr.msk.bf16.gmra.mrb[60].mxu1 %vm1159_vm2, %v3607_v26  ;;  %v3637_v28 = vld [vmem:[#allocation11 + $0x264] ss:$16 sps:$4 sm:$0xff]  }
 0x18c   : > { %2318 = vmatpush1.bf16.msra.mxu1 %v3608_v35 }
 0x18d   : > { %2319 = vmatprep.subr.bf16.mxu1 %v3616_v36  ;;  %v3635_v36 = vld [vmem:[#allocation11 + $0x260] ss:$16 sps:$4 sm:$0xff]  }
 0x18e   : > { %2094 = vmatpush1.bf16.msra.mxu0 %v3611_v31 }
 0x18f   : > { %2176 = vmatprep.subr.bf16.mxu0 %v3619_v32 }
 0x190   : > { %2320 = vmatpush1.bf16.msra.mxu1 %v3614_v37  ;;  %v3638_v37 = vld [vmem:[#allocation11 + $0x268] ss:$16 sps:$4 sm:$0xff]  }
 0x191   : > { %2402 = vmatprep.subr.bf16.mxu1 %v3622_v38 }
 0x1e4   : > { %v614_v50 = vpop.f32.mrb[0].mxu0 }
 0x1e5   : > { %v616_v51 = vpop.f32.mrb[1].mxu0  ;;  %v4551_v6 = vpop.f32.mrb[0].mxu1 }
 0x1e6   : > { %v618_v53 = vpop.f32.mrb[2].mxu0  ;;  %v4553_v10 = vpop.f32.mrb[1].mxu1 }
 0x1e7   : > { %v806_v55 = vpack.c.bf16 %v618_v53, %v614_v50  ;;  %v620_v56 = vpop.f32.mrb[3].mxu0  ;;  %v4555_v14 = vpop.f32.mrb[2].mxu1  ;;  %v3644_v53 = vld [vmem:[#allocation11 + $0x288] ss:$16 sps:$4 sm:$0xff]  }
 0x1e8   : > { %v807_v57 = vpack.c.bf16 %v620_v56, %v616_v51  ;;  %v808_v18 = vpack.c.bf16 %v4555_v14, %v4551_v6  ;;  %v4560_v19 = vpop.f32.mrb[3].mxu1  ;;  %v3641_v51 = vld [vmem:[#allocation11 + $0x280] ss:$16 sps:$4 sm:$0xff]  }
 0x1e9   : > { %v892_v58 = vadd.bf16 %v4542_v52, %v806_v55  ;;  %v809_v21 = vpack.c.bf16 %v4560_v19, %v4553_v10  ;;  %v3704_v10 = vld [vmem:[#allocation11 + $0x3c8] ss:$16 sps:$4 sm:$0xff]  }
 0x1ea   : > { %v893_v59 = vadd.bf16 %v4545_v54, %v807_v57  ;;  %v3649_v57 = vld [vmem:[#allocation11 + $0x2a4] ss:$16 sps:$4 sm:$0xff]  }
 0x1eb   : > { %v924_v1 = vmax.bf16 %v4041_v0, %v892_v58  ;;  %v3652_v58 = vld [vmem:[#allocation11 + $0x2ac] ss:$16 sps:$4 sm:$0xff]  }
 0x1ec   : > { %v624_v60 = vpop.f32.mrb[4].mxu0  ;;  %v925_v61 = vmax.bf16 %v4041_v0, %v893_v59 }
 0x1ed   : > { %v626_v2 = vpop.f32.mrb[5].mxu0  ;;  %v4567_v31 = vpop.f32.mrb[4].mxu1 }
 0x1ee   : > { %v628_v5 = vpop.f32.mrb[6].mxu0  ;;  %2095 = vmatprep.mubr.bf16.mxu0 %v925_v61  ;;  %2321 = vmatprep.mubr.bf16.mxu1 %v925_v61  ;;  %v4569_v34 = vpop.f32.mrb[5].mxu1 }
 0x1ef   : > { %v810_v8 = vpack.c.bf16 %v628_v5, %v624_v60  ;;  %v630_v9 = vpop.f32.mrb[7].mxu0  ;;  %2096 = vmatmul.mubr.bf16.vlgmr.msra.gmra.mrb[32].mxu0 %v924_v1  ;;  %2322 = vmatmul.mubr.bf16.vlgmr.msra.gmra.mrb[32].mxu1 %v924_v1  ;;  %v4571_v38 = vpop.f32.mrb[6].mxu1 }
 0x1f0   : > { %v811_v11 = vpack.c.bf16 %v630_v9, %v626_v2  ;;  %2177 = vmatpush1.bf16.msra.mxu0 %v3617_v62  ;;  %2403 = vmatpush1.bf16.msra.mxu1 %v3620_v63  ;;  %v812_v42 = vpack.c.bf16 %v4571_v38, %v4567_v31  ;;  %v4576_v43 = vpop.f32.mrb[7].mxu1  ;;  %v3647_v2 = vld [vmem:[#allocation11 + $0x2a0] ss:$16 sps:$4 sm:$0xff]   ;;  %v3658_v9 = vld [vmem:[#allocation11 + $0x2cc] ss:$16 sps:$4 sm:$0xff]  }
 0x1f1   : > { %v896_v15 = vadd.bf16 %v4542_v52, %v810_v8  ;;  %2178 = vmatprep.subr.bf16.mxu0 %v3625_v3  ;;  %2404 = vmatprep.subr.bf16.mxu1 %v3628_v4  ;;  %v813_v48 = vpack.c.bf16 %v4576_v43, %v4569_v34  ;;  %v3650_v3 = vld [vmem:[#allocation11 + $0x2a8] ss:$16 sps:$4 sm:$0xff]   ;;  %v3655_v8 = vld [vmem:[#allocation11 + $0x2c4] ss:$16 sps:$4 sm:$0xff]  }
 0x1f2   : > { %v897_v20 = vadd.bf16 %v4545_v54, %v811_v11 }
 0x1f3   : > { %v928_v27 = vmax.bf16 %v4041_v0, %v896_v15 }
 0x1f4   : > { %2179 = vmatpush1.bf16.msra.mxu0 %v3623_v12  ;;  %v634_v22 = vpop.f32.mrb[8].mxu0  ;;  %2405 = vmatpush1.bf16.msra.mxu1 %v3626_v13  ;;  %v929_v23 = vmax.bf16 %v4041_v0, %v897_v20  ;;  %v3653_v20 = vld [vmem:[#allocation11 + $0x2c0] ss:$16 sps:$4 sm:$0xff]  }
 0x1f5   : > { %v636_v26 = vpop.f32.mrb[9].mxu0  ;;  %2180 = vmatprep.subr.bf16.mxu0 %v3631_v16  ;;  %2406 = vmatprep.subr.bf16.mxu1 %v3634_v17  ;;  %v4583_v60 = vpop.f32.mrb[8].mxu1 }
 0x1f6   : > { %v638_v30 = vpop.f32.mrb[10].mxu0  ;;  %2105 = vmatprep.mubr.bf16.mxu0 %v929_v23  ;;  %2331 = vmatprep.mubr.bf16.mxu1 %v929_v23  ;;  %v4585_v63 = vpop.f32.mrb[9].mxu1 }
 0x1f7   : > { %v814_v32 = vpack.c.bf16 %v638_v30, %v634_v22  ;;  %v640_v33 = vpop.f32.mrb[11].mxu0  ;;  %2106 = vmatmul.mubr.bf16.gmra.mrb[36].mxu0 %v928_v27  ;;  %2332 = vmatmul.mubr.bf16.gmra.mrb[36].mxu1 %v928_v27  ;;  %v4587_v4 = vpop.f32.mrb[10].mxu1  ;;  %v3656_v22 = vld [vmem:[#allocation11 + $0x2c8] ss:$16 sps:$4 sm:$0xff]  }
 0x1f8   : > { %v815_v35 = vpack.c.bf16 %v640_v33, %v636_v26  ;;  %2181 = vmatpush1.bf16.msra.mxu0 %v3629_v24  ;;  %2407 = vmatpush1.bf16.msra.mxu1 %v3632_v25  ;;  %v816_v11 = vpack.c.bf16 %v4587_v4, %v4583_v60  ;;  %v4592_v12 = vpop.f32.mrb[11].mxu1  ;;  %v3661_v25 = vld [vmem:[#allocation11 + $0x2e4] ss:$16 sps:$4 sm:$0xff]   ;;  %v3664_v26 = vld [vmem:[#allocation11 + $0x2ec] ss:$16 sps:$4 sm:$0xff]  }
 0x1f9   : > { %v900_v39 = vadd.bf16 %v4542_v52, %v814_v32  ;;  %2182 = vmatprep.subr.bf16.mxu0 %v3637_v28  ;;  %2408 = vmatprep.subr.bf16.mxu1 %v3640_v29  ;;  %v817_v15 = vpack.c.bf16 %v4592_v12, %v4585_v63 }
 0x1fa   : > { %v901_v44 = vadd.bf16 %v4545_v54, %v815_v35  ;;  %v3659_v35 = vld [vmem:[#allocation11 + $0x2e0] ss:$16 sps:$4 sm:$0xff]  }
 0x1fb   : > { %v932_v56 = vmax.bf16 %v4041_v0, %v900_v39 }
 0x1fc   : > { %2183 = vmatpush1.bf16.msra.mxu0 %v3635_v36  ;;  %v644_v49 = vpop.f32.mrb[12].mxu0  ;;  %2409 = vmatpush1.bf16.msra.mxu1 %v3638_v37  ;;  %v933_v50 = vmax.bf16 %v4041_v0, %v901_v44  ;;  %v3662_v36 = vld [vmem:[#allocation11 + $0x2e8] ss:$16 sps:$4 sm:$0xff]  }
 0x1fd   : > { %v646_v55 = vpop.f32.mrb[13].mxu0  ;;  %2184 = vmatprep.subr.bf16.mxu0 %v3643_v40  ;;  %2410 = vmatprep.subr.bf16.mxu1 %v3646_v41  ;;  %v4599_v28 = vpop.f32.mrb[12].mxu1  ;;  %v3667_v40 = vld [vmem:[#allocation11 + $0x304] ss:$16 sps:$4 sm:$0xff]   ;;  %v3670_v41 = vld [vmem:[#allocation11 + $0x30c] ss:$16 sps:$4 sm:$0xff]  }
 0x1fe   : > { %v648_v59 = vpop.f32.mrb[14].mxu0  ;;  %2115 = vmatprep.mubr.bf16.mxu0 %v933_v50  ;;  %2341 = vmatprep.mubr.bf16.mxu1 %v933_v50  ;;  %v4601_v32 = vpop.f32.mrb[13].mxu1 }
 0x1ff   : > { %v818_v61 = vpack.c.bf16 %v648_v59, %v644_v49  ;;  %v650_v62 = vpop.f32.mrb[15].mxu0  ;;  %2116 = vmatmul.mubr.bf16.gmra.mrb[40].mxu0 %v932_v56  ;;  %2342 = vmatmul.mubr.bf16.gmra.mrb[40].mxu1 %v932_v56  ;;  %v4603_v37 = vpop.f32.mrb[14].mxu1  ;;  %v3665_v56 = vld [vmem:[#allocation11 + $0x300] ss:$16 sps:$4 sm:$0xff]  }
 0x200   : > { %v819_v1 = vpack.c.bf16 %v650_v62, %v646_v55  ;;  %2185 = vmatpush1.bf16.msra.mxu0 %v3641_v51  ;;  %2411 = vmatpush1.bf16.msra.mxu1 %v3644_v53  ;;  %v820_v44 = vpack.c.bf16 %v4603_v37, %v4599_v28  ;;  %v4608_v49 = vpop.f32.mrb[15].mxu1  ;;  %v3676_v62 = vld [vmem:[#allocation11 + $0x32c] ss:$16 sps:$4 sm:$0xff]  }
 0x201   : > { %v904_v5 = vadd.bf16 %v4542_v52, %v818_v61  ;;  %2186 = vmatprep.subr.bf16.mxu0 %v3649_v57  ;;  %2412 = vmatprep.subr.bf16.mxu1 %v3652_v58  ;;  %v821_v51 = vpack.c.bf16 %v4608_v49, %v4601_v32  ;;  %v3668_v57 = vld [vmem:[#allocation11 + $0x308] ss:$16 sps:$4 sm:$0xff]   ;;  %v3673_v61 = vld [vmem:[#allocation11 + $0x324] ss:$16 sps:$4 sm:$0xff]  }
 0x202   : > { %v905_v13 = vadd.bf16 %v4545_v54, %v819_v1 }
 0x203   : > { %v936_v24 = vmax.bf16 %v4041_v0, %v904_v5 }
 0x204   : > { %2187 = vmatpush1.bf16.msra.mxu0 %v3647_v2  ;;  %v654_v16 = vpop.f32.mrb[16].mxu0  ;;  %2413 = vmatpush1.bf16.msra.mxu1 %v3650_v3  ;;  %v937_v17 = vmax.bf16 %v4041_v0, %v905_v13  ;;  %v3671_v13 = vld [vmem:[#allocation11 + $0x320] ss:$16 sps:$4 sm:$0xff]  }
 0x205   : > { %v656_v23 = vpop.f32.mrb[17].mxu0  ;;  %2188 = vmatprep.subr.bf16.mxu0 %v3655_v8  ;;  %2414 = vmatprep.subr.bf16.mxu1 %v3658_v9  ;;  %v4615_v2 = vpop.f32.mrb[16].mxu1 }
 0x206   : > { %v658_v27 = vpop.f32.mrb[18].mxu0  ;;  %2125 = vmatprep.mubr.bf16.mxu0 %v937_v17  ;;  %2351 = vmatprep.mubr.bf16.mxu1 %v937_v17  ;;  %v4617_v8 = vpop.f32.mrb[17].mxu1 }
 0x207   : > { %v822_v29 = vpack.c.bf16 %v658_v27, %v654_v16  ;;  %v660_v30 = vpop.f32.mrb[19].mxu0  ;;  %2126 = vmatmul.mubr.bf16.gmra.mrb[44].mxu0 %v936_v24  ;;  %2352 = vmatmul.mubr.bf16.gmra.mrb[44].mxu1 %v936_v24  ;;  %v3674_v16 = vld [vmem:[#allocation11 + $0x328] ss:$16 sps:$4 sm:$0xff]   ;;  %v4619_v17 = vpop.f32.mrb[18].mxu1 }
 0x208   : > { %v823_v33 = vpack.c.bf16 %v660_v30, %v656_v23  ;;  %2189 = vmatpush1.bf16.msra.mxu0 %v3653_v20  ;;  %2415 = vmatpush1.bf16.msra.mxu1 %v3656_v22  ;;  %v3679_v22 = vld [vmem:[#allocation11 + $0x344] ss:$16 sps:$4 sm:$0xff]   ;;  %v3682_v23 = vld [vmem:[#allocation11 + $0x34c] ss:$16 sps:$4 sm:$0xff]   ;;  %v824_v24 = vpack.c.bf16 %v4619_v17, %v4615_v2 }
 0x209   : > { %v908_v39 = vadd.bf16 %v4542_v52, %v822_v29  ;;  %2190 = vmatprep.subr.bf16.mxu0 %v3661_v25  ;;  %2416 = vmatprep.subr.bf16.mxu1 %v3664_v26  ;;  %v4624_v25 = vpop.f32.mrb[19].mxu1 }
 0x20a   : > { %v909_v50 = vadd.bf16 %v4545_v54, %v823_v33  ;;  %v825_v27 = vpack.c.bf16 %v4624_v25, %v4617_v8  ;;  %v3677_v33 = vld [vmem:[#allocation11 + $0x340] ss:$16 sps:$4 sm:$0xff]  }
 0x20b   : > { %v940_v59 = vmax.bf16 %v4041_v0, %v908_v39 }
 0x20c   : > { %2191 = vmatpush1.bf16.msra.mxu0 %v3659_v35  ;;  %v664_v53 = vpop.f32.mrb[20].mxu0  ;;  %2417 = vmatpush1.bf16.msra.mxu1 %v3662_v36  ;;  %v941_v55 = vmax.bf16 %v4041_v0, %v909_v50  ;;  %v3680_v35 = vld [vmem:[#allocation11 + $0x348] ss:$16 sps:$4 sm:$0xff]   ;;  %v863_v50 = vcombine.high %v4532_v46, %v4532_v46 }
 0x20d   : > { %v666_v58 = vpop.f32.mrb[21].mxu0  ;;  %2192 = vmatprep.subr.bf16.mxu0 %v3667_v40  ;;  %2418 = vmatprep.subr.bf16.mxu1 %v3670_v41  ;;  %v3685_v40 = vld [vmem:[#allocation11 + $0x364] ss:$16 sps:$4 sm:$0xff]   ;;  %v3688_v41 = vld [vmem:[#allocation11 + $0x36c] ss:$16 sps:$4 sm:$0xff]  }
 0x20e   : > { %v668_v1 = vpop.f32.mrb[22].mxu0  ;;  %2135 = vmatprep.mubr.bf16.mxu0 %v941_v55  ;;  %2361 = vmatprep.mubr.bf16.mxu1 %v941_v55  ;;  %v4633_v55 = vpop.f32.mrb[20].mxu1 }
 0x20f   : > { %v826_v3 = vpack.c.bf16 %v668_v1, %v664_v53  ;;  %v670_v5 = vpop.f32.mrb[23].mxu0  ;;  %2136 = vmatmul.mubr.bf16.gmra.mrb[48].mxu0 %v940_v59  ;;  %2362 = vmatmul.mubr.bf16.gmra.mrb[48].mxu1 %v940_v59 }
 0x210   : > { %v827_v9 = vpack.c.bf16 %v670_v5, %v666_v58  ;;  %2193 = vmatpush1.bf16.msra.mxu0 %v3665_v56  ;;  %2419 = vmatpush1.bf16.msra.mxu1 %v3668_v57  ;;  %v4635_v58 = vpop.f32.mrb[21].mxu1  ;;  %v3694_v5 = vld [vmem:[#allocation11 + $0x38c] ss:$16 sps:$4 sm:$0xff]  }
 0x211   : > { %v912_v20 = vadd.bf16 %v4542_v52, %v826_v3  ;;  %2194 = vmatprep.subr.bf16.mxu0 %v3673_v61  ;;  %2420 = vmatprep.subr.bf16.mxu1 %v3676_v62  ;;  %v3683_v61 = vld [vmem:[#allocation11 + $0x360] ss:$16 sps:$4 sm:$0xff]   ;;  %v3686_v62 = vld [vmem:[#allocation11 + $0x368] ss:$16 sps:$4 sm:$0xff]   ;;  %v4637_v1 = vpop.f32.mrb[22].mxu1 }
 0x212   : > { %v913_v26 = vadd.bf16 %v4545_v54, %v827_v9  ;;  %v3691_v3 = vld [vmem:[#allocation11 + $0x384] ss:$16 sps:$4 sm:$0xff]   ;;  %v886_v9 = vpack.i.b16 %v863_v50, %v863_v50 }
 0x213   : > { %v944_v39 = vmax.bf16 %v4041_v0, %v912_v20 }
 0x214   : > { %2195 = vmatpush1.bf16.msra.mxu0 %v3671_v13  ;;  %v674_v29 = vpop.f32.mrb[24].mxu0  ;;  %2421 = vmatpush1.bf16.msra.mxu1 %v3674_v16  ;;  %v945_v30 = vmax.bf16 %v4041_v0, %v913_v26  ;;  %v828_v13 = vpack.c.bf16 %v4637_v1, %v4633_v55  ;;  %v4642_v16 = vpop.f32.mrb[23].mxu1  ;;  %v2515_v1 = vld [vmem:[#allocation14] sm:$0xf] }
 0x215   : > { %v676_v36 = vpop.f32.mrb[25].mxu0  ;;  %2196 = vmatprep.subr.bf16.mxu0 %v3679_v22  ;;  %2422 = vmatprep.subr.bf16.mxu1 %v3682_v23  ;;  %v829_v22 = vpack.c.bf16 %v4642_v16, %v4635_v58  ;;  %v2527_v58 = vsub.s32 2, %v4445_v7  ;;  %v2531_v16 = vsub.s32 3, %v4445_v7 }
 0x216   : > { %v678_v53 = vpop.f32.mrb[26].mxu0  ;;  %2145 = vmatprep.mubr.bf16.mxu0 %v945_v30  ;;  %2371 = vmatprep.mubr.bf16.mxu1 %v945_v30  ;;  %v3692_v30 = vld [vmem:[#allocation11 + $0x388] ss:$16 sps:$4 sm:$0xff]  }
 0x217   : > { %v830_v56 = vpack.c.bf16 %v678_v53, %v674_v29  ;;  %v680_v57 = vpop.f32.mrb[27].mxu0  ;;  %2146 = vmatmul.mubr.bf16.gmra.mrb[52].mxu0 %v944_v39  ;;  %2372 = vmatmul.mubr.bf16.gmra.mrb[52].mxu1 %v944_v39  ;;  %v3689_v29 = vld [vmem:[#allocation11 + $0x380] ss:$16 sps:$4 sm:$0xff]   ;;  %v3697_v39 = vld [vmem:[#allocation11 + $0x3a4] ss:$16 sps:$4 sm:$0xff]   ;;  %v4654_v53 = vpop.f32.mrb[24].mxu1 }
 0x218   : > { %v831_v59 = vpack.c.bf16 %v680_v57, %v676_v36  ;;  %2197 = vmatpush1.bf16.msra.mxu0 %v3677_v33  ;;  %2423 = vmatpush1.bf16.msra.mxu1 %v3680_v35  ;;  %v862_v33 = vcombine.high %v4530_v45, %v4530_v45  ;;  %v4656_v45 = vpop.f32.mrb[25].mxu1 }
 0x219   : > { %v916_v46 = vadd.bf16 %v4542_v52, %v830_v56  ;;  %2198 = vmatprep.subr.bf16.mxu0 %v3685_v40  ;;  %2424 = vmatprep.subr.bf16.mxu1 %v3688_v41  ;;  %v3700_v40 = vld [vmem:[#allocation11 + $0x3ac] ss:$16 sps:$4 sm:$0xff]   ;;  %v4652_v41 = vrot.slane %v886_v9, %v4535_v47 }
 0x21a   : > { %v917_v20 = vadd.bf16 %v4545_v54, %v831_v59 }
 0x21b   : > { %v948_v36 = vmax.bf16 %v4041_v0, %v916_v46  ;;  %v3698_v46 = vld [vmem:[#allocation11 + $0x3a8] ss:$16 sps:$4 sm:$0xff]   ;;  %v895_v9 = vadd.bf16 %v4652_v41, %v809_v21  ;;  %v903_v6 = vadd.bf16 %v4652_v41, %v817_v15  ;;  %v907_v63 = vadd.bf16 %v4652_v41, %v821_v51 }
 0x21c   : > { %2199 = vmatpush1.bf16.msra.mxu0 %v3683_v61  ;;  %v684_v23 = vpop.f32.mrb[28].mxu0  ;;  %2425 = vmatpush1.bf16.msra.mxu1 %v3686_v62  ;;  %v949_v26 = vmax.bf16 %v4041_v0, %v917_v20  ;;  %v3695_v61 = vld [vmem:[#allocation11 + $0x3a0] ss:$16 sps:$4 sm:$0xff]   ;;  %v879_v62 = vpack.i.b16 %v862_v33, %v862_v33  ;;  %v3703_v20 = vld [vmem:[#allocation11 + $0x3c4] ss:$16 sps:$4 sm:$0xff]   ;;  %v911_v12 = vadd.bf16 %v4652_v41, %v825_v27 }
 0x21d   : > { %v686_v35 = vpop.f32.mrb[29].mxu0  ;;  %2200 = vmatprep.subr.bf16.mxu0 %v3691_v3  ;;  %2426 = vmatprep.subr.bf16.mxu1 %v3694_v5  ;;  %v4658_v3 = vpop.f32.mrb[26].mxu1  ;;  %v939_v38 = vmax.bf16 %v4041_v0, %v907_v63  ;;  %v915_v15 = vadd.bf16 %v4652_v41, %v829_v22  ;;  %v4760_v22 = vrot.slane %v2515_v1, %v4535_v47 }
 0x21e   : > { %v688_v50 = vpop.f32.mrb[30].mxu0  ;;  %2155 = vmatprep.mubr.bf16.mxu0 %v949_v26  ;;  %2381 = vmatprep.mubr.bf16.mxu1 %v949_v26  ;;  %v832_v26 = vpack.c.bf16 %v4658_v3, %v4654_v53  ;;  %v4674_v19 = vrot.slane %v879_v62, %v4535_v47  ;;  %v943_v4 = vmax.bf16 %v4041_v0, %v911_v12 }
 0x21f   : > { %v834_v56 = vpack.c.bf16 %v688_v50, %v684_v23  ;;  %v690_v57 = vpop.f32.mrb[31].mxu0  ;;  %2156 = vmatmul.mubr.bf16.gmra.mrb[56].mxu0 %v948_v36  ;;  %2382 = vmatmul.mubr.bf16.gmra.mrb[56].mxu1 %v948_v36  ;;  %v3706_v23 = vld [vmem:[#allocation11 + $0x3cc] ss:$16 sps:$4 sm:$0xff]   ;;  %v3709_v36 = vld [vmem:[#allocation11 + $0x3e4] ss:$16 sps:$4 sm:$0xff]   ;;  %v947_v32 = vmax.bf16 %v4041_v0, %v915_v15  ;;  %v4766_v3 = vrot.slane %v2515_v1, %v2531_v16 }
 0x220   : > { %v835_v59 = vpack.c.bf16 %v690_v57, %v686_v35  ;;  %2201 = vmatpush1.bf16.msra.mxu0 %v3689_v29  ;;  %2427 = vmatpush1.bf16.msra.mxu1 %v3692_v30  ;;  %v4667_v29 = vpop.f32.mrb[27].mxu1  ;;  %v3701_v35 = vld [vmem:[#allocation11 + $0x3c0] ss:$16 sps:$4 sm:$0xff]   ;;  %v3710_v57 = vld [vmem:[#allocation11 + $0x3e8] ss:$16 sps:$4 sm:$0xff]   ;;  %v894_v62 = vadd.bf16 %v4674_v19, %v808_v18  ;;  %v898_v14 = vadd.bf16 %v4674_v19, %v812_v42 }
 0x221   : > { %v920_v5 = vadd.bf16 %v4542_v52, %v834_v56  ;;  %2202 = vmatprep.subr.bf16.mxu0 %v3697_v39  ;;  %2428 = vmatprep.subr.bf16.mxu1 %v3700_v40  ;;  %v833_v33 = vpack.c.bf16 %v4667_v29, %v4656_v45  ;;  %v927_v39 = vmax.bf16 %v4041_v0, %v895_v9  ;;  %v4678_v40 = vpop.f32.mrb[28].mxu1  ;;  %v3707_v56 = vld [vmem:[#allocation11 + $0x3e0] ss:$16 sps:$4 sm:$0xff]   ;;  %v2665_v45 = vld [vmem:[#allocation15] sm:$0xf] }
 0x222   : > { %v921_v30 = vadd.bf16 %v4545_v54, %v835_v59  ;;  %v3712_v54 = vld [vmem:[#allocation11 + $0x3ec] ss:$16 sps:$4 sm:$0xff]   ;;  %v4680_v50 = vpop.f32.mrb[29].mxu1  ;;  %v899_v59 = vadd.bf16 %v4652_v41, %v813_v48  ;;  %v926_v43 = vmax.bf16 %v4041_v0, %v894_v62  ;;  %v935_v18 = vmax.bf16 %v4041_v0, %v903_v6 }
 0x223   : > { %v952_v21 = vmax.bf16 %v4041_v0, %v920_v5  ;;  %v930_v48 = vmax.bf16 %v4041_v0, %v898_v14  ;;  %v902_v31 = vadd.bf16 %v4674_v19, %v816_v11  ;;  %v906_v60 = vadd.bf16 %v4674_v19, %v820_v44 }
 0x224   : > { %2203 = vmatpush1.bf16.msra.mxu0 %v3695_v61  ;;  %2429 = vmatpush1.bf16.msra.mxu1 %v3698_v46  ;;  %v953_v52 = vmax.bf16 %v4041_v0, %v921_v30  ;;  %v4686_v61 = vpop.f32.mrb[30].mxu1  ;;  %v931_v34 = vmax.bf16 %v4041_v0, %v899_v59  ;;  %v910_v28 = vadd.bf16 %v4674_v19, %v824_v24 }
 0x225   : > { %2204 = vmatprep.subr.bf16.mxu0 %v3703_v20  ;;  %2430 = vmatprep.subr.bf16.mxu1 %v3706_v23  ;;  %v836_v46 = vpack.c.bf16 %v4686_v61, %v4678_v40  ;;  %v803_v5 = vpop.f32.mrb[31].mxu1  ;;  %v934_v42 = vmax.bf16 %v4041_v0, %v902_v31  ;;  %v938_v11 = vmax.bf16 %v4041_v0, %v906_v60 }
 0x226   : > { %2165 = vmatprep.mubr.bf16.mxu0 %v953_v52  ;;  %2391 = vmatprep.mubr.bf16.mxu1 %v953_v52  ;;  %v837_v9 = vpack.c.bf16 %v803_v5, %v4680_v50  ;;  %v942_v37 = vmax.bf16 %v4041_v0, %v910_v28  ;;  %v919_v44 = vadd.bf16 %v4652_v41, %v833_v33 }
 0x227   : > { %2166 = vmatmul.mubr.bf16.gmra.mrb[60].mxu0 %v952_v21  ;;  %2392 = vmatmul.mubr.bf16.gmra.mrb[60].mxu1 %v952_v21  ;;  %v914_v49 = vadd.bf16 %v4674_v19, %v828_v13  ;;  %v918_v17 = vadd.bf16 %v4674_v19, %v832_v26  ;;  %v922_v27 = vadd.bf16 %v4674_v19, %v836_v46  ;;  %v2523_v13 = vsub.s32 1, %v4445_v7 }
 0x228   : > { %2205 = vmatpush1.bf16.msra.mxu0 %v3701_v35  ;;  %2431 = vmatpush1.bf16.msra.mxu1 %v3704_v10  ;;  %v951_v51 = vmax.bf16 %v4041_v0, %v919_v44  ;;  %v923_v8 = vadd.bf16 %v4652_v41, %v837_v9  ;;  %v4762_v41 = vrot.slane %v2515_v1, %v2527_v58 }
 0x229   : > { %2206 = vmatprep.subr.bf16.mxu0 %v3709_v36  ;;  %2208 = vmatprep.mubr.bf16.mxu0 %v927_v39  ;;  %v946_v2 = vmax.bf16 %v4041_v0, %v914_v49  ;;  %v950_v25 = vmax.bf16 %v4041_v0, %v918_v17  ;;  %v954_v55 = vmax.bf16 %v4041_v0, %v922_v27 }
 0x22a   : > { %2432 = vmatprep.subr.bf16.mxu1 %v3712_v54  ;;  %2434 = vmatprep.mubr.bf16.mxu1 %v927_v39  ;;  %v955_v24 = vmax.bf16 %v4041_v0, %v923_v8  ;;  %v4764_v53 = vrot.slane %v2515_v1, %v2523_v13  ;;  %v4769_v23 = vrot.slane %v2665_v45, %v4535_v47 }
 0x22b   : > { %v4773_v33 = vrot.slane %v2665_v45, %v2523_v13  ;;  %v4776_v19 = vrot.slane %v2665_v45, %v2527_v58  ;;  %v4784_v5 = vrot.slane %v2665_v45, %v2531_v16 }
 0x22c   : > { %2207 = vmatpush1.bf16.msra.mxu0 %v3707_v56  ;;  %2433 = vmatpush1.bf16.msra.mxu1 %v3710_v57 }
 0x22f   : > { %2209 = vmatmul.mubr.bf16.vlgmr.msra.gmra.mrb[32].mxu0 %v926_v43  ;;  %2435 = vmatmul.mubr.bf16.vlgmr.msra.gmra.mrb[32].mxu1 %v926_v43 }
 0x230   : > { %2218 = vmatprep.mubr.bf16.mxu0 %v931_v34  ;;  %2444 = vmatprep.mubr.bf16.mxu1 %v931_v34 }
 0x237   : > { %2219 = vmatmul.mubr.bf16.gmra.mrb[36].mxu0 %v930_v48  ;;  %2445 = vmatmul.mubr.bf16.gmra.mrb[36].mxu1 %v930_v48 }
 0x238   : > { %2228 = vmatprep.mubr.bf16.mxu0 %v935_v18  ;;  %2454 = vmatprep.mubr.bf16.mxu1 %v935_v18 }
 0x23f   : > { %2229 = vmatmul.mubr.bf16.gmra.mrb[40].mxu0 %v934_v42  ;;  %2455 = vmatmul.mubr.bf16.gmra.mrb[40].mxu1 %v934_v42 }
 0x240   : > { %2238 = vmatprep.mubr.bf16.mxu0 %v939_v38  ;;  %2464 = vmatprep.mubr.bf16.mxu1 %v939_v38 }
 0x247   : > { %2239 = vmatmul.mubr.bf16.gmra.mrb[44].mxu0 %v938_v11  ;;  %2465 = vmatmul.mubr.bf16.gmra.mrb[44].mxu1 %v938_v11 }
 0x248   : > { %2248 = vmatprep.mubr.bf16.mxu0 %v943_v4  ;;  %2474 = vmatprep.mubr.bf16.mxu1 %v943_v4 }
 0x24f   : > { %2249 = vmatmul.mubr.bf16.gmra.mrb[48].mxu0 %v942_v37  ;;  %2475 = vmatmul.mubr.bf16.gmra.mrb[48].mxu1 %v942_v37 }
 0x250   : > { %2258 = vmatprep.mubr.bf16.mxu0 %v947_v32  ;;  %2484 = vmatprep.mubr.bf16.mxu1 %v947_v32 }
 0x257   : > { %2259 = vmatmul.mubr.bf16.gmra.mrb[52].mxu0 %v946_v2  ;;  %2485 = vmatmul.mubr.bf16.gmra.mrb[52].mxu1 %v946_v2 }
 0x258   : > { %2268 = vmatprep.mubr.bf16.mxu0 %v951_v51  ;;  %2494 = vmatprep.mubr.bf16.mxu1 %v951_v51 }
 0x25f   : > { %2269 = vmatmul.mubr.bf16.gmra.mrb[56].mxu0 %v950_v25  ;;  %2495 = vmatmul.mubr.bf16.gmra.mrb[56].mxu1 %v950_v25 }
 0x260   : > { %2278 = vmatprep.mubr.bf16.mxu0 %v955_v24  ;;  %2504 = vmatprep.mubr.bf16.mxu1 %v955_v24 }
 0x267   : > { %2279 = vmatmul.mubr.bf16.gmra.mrb[60].mxu0 %v954_v55  ;;  %2505 = vmatmul.mubr.bf16.gmra.mrb[60].mxu1 %v954_v55 }
 0x302   : > { %v2210_v0 = vpop.f32.mrb[32].mxu0  ;;  %v2436_v20 = vpop.f32.mrb[32].mxu1 }
 0x303   : > { %v2537_v26 = vadd.f32 %v4760_v22, %v2210_v0  ;;  %v2539_v29 = vadd.f32 %v4762_v41, %v2436_v20  ;;  %v2212_v7 = vpop.f32.mrb[33].mxu0  ;;  %v2438_v30 = vpop.f32.mrb[33].mxu1 }
 0x304   : > { %v2538_v52 = vadd.f32 %v4764_v53, %v2212_v7  ;;  %v2214_v35 = vpop.f32.mrb[34].mxu0  ;;  %v2440_v10 = vpop.f32.mrb[34].mxu1  ;;  %v2540_v50 = vadd.f32 %v4766_v3, %v2438_v30 }
 0x305   : > { %v2601_v21 = vmax.f32 %v2537_v26, 0.0  ;;  %v2541_v36 = vadd.f32 %v4760_v22, %v2214_v35  ;;  %v2216_v39 = vpop.f32.mrb[35].mxu0  ;;  %v2442_v47 = vpop.f32.mrb[35].mxu1  ;;  %v2603_v54 = vmax.f32 %v2539_v29, 0.0  ;;  %v2543_v61 = vadd.f32 %v4762_v41, %v2440_v10 }
 0x306   : > { %v2602_v40 = vmax.f32 %v2538_v52, 0.0  ;;  %v2542_v56 = vadd.f32 %v4764_v53, %v2216_v39  ;;  %v2544_v34 = vadd.f32 %v4766_v3, %v2442_v47  ;;  %v2604_v6 = vmax.f32 %v2540_v50, 0.0 }
 0x307   : > { %v2687_v57 = vmul.f32 %v4769_v23, %v2601_v21  ;;  %v2605_v59 = vmax.f32 %v2541_v36, 0.0  ;;  %v2689_v43 = vmul.f32 %v4776_v19, %v2603_v54  ;;  %v2607_v31 = vmax.f32 %v2543_v61, 0.0 }
 0x308   : > { %v2688_v62 = vmul.f32 %v4773_v33, %v2602_v40  ;;  %v2606_v46 = vmax.f32 %v2542_v56, 0.0  ;;  %v2608_v37 = vmax.f32 %v2544_v34, 0.0  ;;  %v2690_v27 = vmul.f32 %v4784_v5, %v2604_v6 }
 0x309   : > { %v2691_v9 = vmul.f32 %v4769_v23, %v2605_v59  ;;  %v2693_v55 = vmul.f32 %v4776_v19, %v2607_v31 }
 0x30a   : > { %v2692_v14 = vmul.f32 %v4773_v33, %v2606_v46  ;;  %v2220_v18 = vpop.f32.mrb[36].mxu0  ;;  %v2446_v48 = vpop.f32.mrb[36].mxu1  ;;  %v2751_v63 = vadd.f32 %v2688_v62, %v2687_v57  ;;  %v2694_v26 = vmul.f32 %v4784_v5, %v2608_v37 }
 0x30b   : > { %v2545_v38 = vadd.f32 %v4760_v22, %v2220_v18  ;;  %v2547_v42 = vadd.f32 %v4762_v41, %v2446_v48  ;;  %v2222_v12 = vpop.f32.mrb[37].mxu0  ;;  %v2448_v60 = vpop.f32.mrb[37].mxu1 }
 0x30c   : > { %v2756_v4 = vadd.f32 %v2692_v14, %v2691_v9  ;;  %v2546_v11 = vadd.f32 %v4764_v53, %v2222_v12  ;;  %v2224_v15 = vpop.f32.mrb[38].mxu0  ;;  %v2450_v28 = vpop.f32.mrb[38].mxu1  ;;  %v2752_v32 = vadd.f32 %v2751_v63, %v2689_v43  ;;  %v2548_v1 = vadd.f32 %v4766_v3, %v2448_v60 }
 0x30d   : > { %v2609_v44 = vmax.f32 %v2545_v38, 0.0  ;;  %v2549_v49 = vadd.f32 %v4760_v22, %v2224_v15  ;;  %v2551_v51 = vadd.f32 %v4762_v41, %v2450_v28  ;;  %v2226_v2 = vpop.f32.mrb[39].mxu0  ;;  %v2452_v8 = vpop.f32.mrb[39].mxu1  ;;  %v2611_v17 = vmax.f32 %v2547_v42, 0.0 }
 0x30e   : > { %v2610_v24 = vmax.f32 %v2546_v11, 0.0  ;;  %v2550_v25 = vadd.f32 %v4764_v53, %v2226_v2  ;;  %v2552_v0 = vadd.f32 %v4766_v3, %v2452_v8  ;;  %v2753_v20 = vadd.f32 %v2752_v32, %v2690_v27 }
 0x30f   : > { %v2695_v58 = vmul.f32 %v4769_v23, %v2609_v44  ;;  %v2613_v13 = vmax.f32 %v2549_v49, 0.0  ;;  %v2615_v7 = vmax.f32 %v2551_v51, 0.0  ;;  %v2757_v30 = vadd.f32 %v2756_v4, %v2693_v55 }
 0x310   : > { %v2696_v16 = vmul.f32 %v4773_v33, %v2610_v24  ;;  %v2614_v45 = vmax.f32 %v2550_v25, 0.0  ;;  %v2697_v52 = vmul.f32 %v4776_v19, %v2611_v17  ;;  %2754 = vadd.xlane.f32.xlu0 %v2753_v20  ;;  %v2612_v39 = vmax.f32 %v2548_v1, 0.0 }
 0x311   : > { %v2699_v29 = vmul.f32 %v4769_v23, %v2613_v13  ;;  %v2758_v56 = vadd.f32 %v2757_v30, %v2694_v26  ;;  %v2616_v59 = vmax.f32 %v2552_v0, 0.0  ;;  %v2701_v34 = vmul.f32 %v4776_v19, %v2615_v7 }
 0x312   : > { %v2700_v35 = vmul.f32 %v4773_v33, %v2614_v45  ;;  %v2230_v10 = vpop.f32.mrb[40].mxu0  ;;  %v2456_v21 = vpop.f32.mrb[40].mxu1  ;;  %v2761_v36 = vadd.f32 %v2696_v16, %v2695_v58  ;;  %v2698_v11 = vmul.f32 %v4784_v5, %v2612_v39 }
 0x313   : > { %v2553_v47 = vadd.f32 %v4760_v22, %v2230_v10  ;;  %v2555_v54 = vadd.f32 %v4762_v41, %v2456_v21  ;;  %v2232_v40 = vpop.f32.mrb[41].mxu0  ;;  %v2458_v50 = vpop.f32.mrb[41].mxu1  ;;  %v2702_v15 = vmul.f32 %v4784_v5, %v2616_v59 }
 0x314   : > { %v2766_v57 = vadd.f32 %v2700_v35, %v2699_v29  ;;  %v2554_v61 = vadd.f32 %v4764_v53, %v2232_v40  ;;  %v2460_v62 = vpop.f32.mrb[42].mxu1  ;;  %v2234_v46 = vpop.f32.mrb[42].mxu0  ;;  %v2762_v9 = vadd.f32 %v2761_v36, %v2697_v52  ;;  %v2556_v6 = vadd.f32 %v4766_v3, %v2458_v50  ;;  %2759 = vadd.xlane.f32.xlu0 %v2758_v56 }
 0x315   : > { %v2617_v43 = vmax.f32 %v2553_v47, 0.0  ;;  %v2557_v14 = vadd.f32 %v4760_v22, %v2234_v46  ;;  %v2236_v18 = vpop.f32.mrb[43].mxu0  ;;  %v2462_v48 = vpop.f32.mrb[43].mxu1  ;;  %v2619_v63 = vmax.f32 %v2555_v54, 0.0  ;;  %v2559_v38 = vadd.f32 %v4762_v41, %v2460_v62 }
 0x316   : > { %v2618_v31 = vmax.f32 %v2554_v61, 0.0  ;;  %v2558_v42 = vadd.f32 %v4764_v53, %v2236_v18  ;;  %v2560_v4 = vadd.f32 %v4766_v3, %v2462_v48  ;;  %v2620_v37 = vmax.f32 %v2556_v6, 0.0 }
 0x317   : > { %v2703_v12 = vmul.f32 %v4769_v23, %v2617_v43  ;;  %v2621_v60 = vmax.f32 %v2557_v14, 0.0  ;;  %v2763_v49 = vadd.f32 %v2762_v9, %v2698_v11  ;;  %v2767_v51 = vadd.f32 %v2766_v57, %v2701_v34 }
 0x318   : > { %v2704_v28 = vmul.f32 %v4773_v33, %v2618_v31  ;;  %v2622_v32 = vmax.f32 %v2558_v42, 0.0  ;;  %v2705_v2 = vmul.f32 %v4776_v19, %v2619_v63  ;;  %v2623_v17 = vmax.f32 %v2559_v38, 0.0 }
 0x319   : > { %v2707_v44 = vmul.f32 %v4769_v23, %v2621_v60  ;;  %v2624_v55 = vmax.f32 %v2560_v4, 0.0  ;;  %2764 = vadd.xlane.f32.xlu1 %v2763_v49  ;;  %v2768_v45 = vadd.f32 %v2767_v51, %v2702_v15  ;;  %v2706_v36 = vmul.f32 %v4784_v5, %v2620_v37 }
 0x31a   : > { %v2771_v8 = vadd.f32 %v2704_v28, %v2703_v12  ;;  %v2708_v24 = vmul.f32 %v4773_v33, %v2622_v32  ;;  %v2240_v25 = vpop.f32.mrb[44].mxu0  ;;  %v2466_v27 = vpop.f32.mrb[44].mxu1  ;;  %v2709_v40 = vmul.f32 %v4776_v19, %v2623_v17 }
 0x31b   : > { %v2561_v58 = vadd.f32 %v4760_v22, %v2240_v25  ;;  %v2563_v1 = vadd.f32 %v4762_v41, %v2466_v27  ;;  %v2242_v13 = vpop.f32.mrb[45].mxu0  ;;  %v2468_v16 = vpop.f32.mrb[45].mxu1  ;;  %v2710_v59 = vmul.f32 %v4784_v5, %v2624_v55 }
 0x31c   : > { %v2776_v0 = vadd.f32 %v2708_v24, %v2707_v44  ;;  %v2562_v20 = vadd.f32 %v4764_v53, %v2242_v13  ;;  %v2564_v26 = vadd.f32 %v4766_v3, %v2468_v16  ;;  %v2470_v29 = vpop.f32.mrb[46].mxu1  ;;  %v2244_v7 = vpop.f32.mrb[46].mxu0  ;;  %v2772_v30 = vadd.f32 %v2771_v8, %v2705_v2 }
 0x31d   : > { %v2625_v52 = vmax.f32 %v2561_v58, 0.0  ;;  %v2565_v35 = vadd.f32 %v4760_v22, %v2244_v7  ;;  %v2246_v10 = vpop.f32.mrb[47].mxu0  ;;  %v2472_v21 = vpop.f32.mrb[47].mxu1  ;;  %v2627_v39 = vmax.f32 %v2563_v1, 0.0  ;;  %v2567_v56 = vadd.f32 %v4762_v41, %v2470_v29  ;;  %2769 = vadd.xlane.f32.xlu1 %v2768_v45 }
 0x31e   : > { %v2626_v47 = vmax.f32 %v2562_v20, 0.0  ;;  %v2566_v54 = vadd.f32 %v4764_v53, %v2246_v10  ;;  %v2628_v62 = vmax.f32 %v2564_v26, 0.0  ;;  %v2568_v34 = vadd.f32 %v4766_v3, %v2472_v21 }
 0x31f   : > { %v2711_v50 = vmul.f32 %v4769_v23, %v2625_v52  ;;  %v2629_v57 = vmax.f32 %v2565_v35, 0.0  ;;  %v2773_v43 = vadd.f32 %v2772_v30, %v2706_v36  ;;  %v2777_v6 = vadd.f32 %v2776_v0, %v2709_v40 }
 0x320   : > { %v2712_v61 = vmul.f32 %v4773_v33, %v2626_v47  ;;  %v2630_v46 = vmax.f32 %v2566_v54, 0.0  ;;  %v2713_v14 = vmul.f32 %v4776_v19, %v2627_v39  ;;  %v2631_v38 = vmax.f32 %v2567_v56, 0.0 }
 0x321   : > { %v2715_v9 = vmul.f32 %v4769_v23, %v2629_v57  ;;  %2774 = vadd.xlane.f32.xlu0 %v2773_v43  ;;  %v2778_v12 = vadd.f32 %v2777_v6, %v2710_v59  ;;  %v2714_v49 = vmul.f32 %v4784_v5, %v2628_v62  ;;  %v2632_v51 = vmax.f32 %v2568_v34, 0.0 }
 0x322   : > { %v2781_v18 = vadd.f32 %v2712_v61, %v2711_v50  ;;  %v2716_v48 = vmul.f32 %v4773_v33, %v2630_v46  ;;  %v2476_v63 = vpop.f32.mrb[48].mxu1  ;;  %v2250_v31 = vpop.f32.mrb[48].mxu0  ;;  %v2717_v1 = vmul.f32 %v4776_v19, %v2631_v38 }
 0x323   : > { %v2571_v42 = vadd.f32 %v4762_v41, %v2476_v63  ;;  %v2569_v60 = vadd.f32 %v4760_v22, %v2250_v31  ;;  %v2252_v4 = vpop.f32.mrb[49].mxu0  ;;  %v2478_v11 = vpop.f32.mrb[49].mxu1  ;;  %2779 = vadd.xlane.f32.xlu1 %v2778_v12  ;;  %v2718_v29 = vmul.f32 %v4784_v5, %v2632_v51 }
 0x324   : > { %v2786_v15 = vadd.f32 %v2716_v48, %v2715_v9  ;;  %v2570_v28 = vadd.f32 %v4764_v53, %v2252_v4  ;;  %v2254_v32 = vpop.f32.mrb[50].mxu0  ;;  %v2480_v37 = vpop.f32.mrb[50].mxu1  ;;  %v2782_v44 = vadd.f32 %v2781_v18, %v2713_v14  ;;  %v2572_v55 = vadd.f32 %v4766_v3, %v2478_v11 }
 0x325   : > { %v2633_v2 = vmax.f32 %v2569_v60, 0.0  ;;  %v2573_v8 = vadd.f32 %v4760_v22, %v2254_v32  ;;  %v2256_v17 = vpop.f32.mrb[51].mxu0  ;;  %v2482_v24 = vpop.f32.mrb[51].mxu1  ;;  %v2635_v25 = vmax.f32 %v2571_v42, 0.0  ;;  %v2575_v45 = vadd.f32 %v4762_v41, %v2480_v37 }
 0x326   : > { %v2634_v27 = vmax.f32 %v2570_v28, 0.0  ;;  %v2574_v58 = vadd.f32 %v4764_v53, %v2256_v17  ;;  %v2576_v26 = vadd.f32 %v4766_v3, %v2482_v24  ;;  %v2783_v30 = vadd.f32 %v2782_v44, %v2714_v49 }
 0x327   : > { %v2719_v13 = vmul.f32 %v4769_v23, %v2633_v2  ;;  %v2637_v16 = vmax.f32 %v2573_v8, 0.0  ;;  %v2787_v52 = vadd.f32 %v2786_v15, %v2717_v1  ;;  %v2721_v35 = vmul.f32 %v4776_v19, %v2635_v25 }
 0x328   : > { %v2720_v0 = vmul.f32 %v4773_v33, %v2634_v27  ;;  %v2638_v20 = vmax.f32 %v2574_v58, 0.0  ;;  %v2636_v21 = vmax.f32 %v2572_v55, 0.0  ;;  %v2639_v54 = vmax.f32 %v2575_v45, 0.0  ;;  %2784 = vadd.xlane.f32.xlu0 %v2783_v30 }
 0x329   : > { %v2723_v7 = vmul.f32 %v4769_v23, %v2637_v16  ;;  %v2788_v50 = vadd.f32 %v2787_v52, %v2718_v29  ;;  %v2640_v62 = vmax.f32 %v2576_v26, 0.0 }
 0x32a   : > { %v2791_v10 = vadd.f32 %v2720_v0, %v2719_v13  ;;  %v2724_v36 = vmul.f32 %v4773_v33, %v2638_v20  ;;  %v2486_v39 = vpop.f32.mrb[52].mxu1  ;;  %v2260_v47 = vpop.f32.mrb[52].mxu0  ;;  %v2722_v31 = vmul.f32 %v4784_v5, %v2636_v21  ;;  %v2725_v60 = vmul.f32 %v4776_v19, %v2639_v54 }
 0x32b   : > { %v2579_v40 = vadd.f32 %v4762_v41, %v2486_v39  ;;  %v2577_v56 = vadd.f32 %v4760_v22, %v2260_v47  ;;  %v2262_v57 = vpop.f32.mrb[53].mxu0  ;;  %v2488_v59 = vpop.f32.mrb[53].mxu1  ;;  %2789 = vadd.xlane.f32.xlu1 %v2788_v50  ;;  %v2726_v28 = vmul.f32 %v4784_v5, %v2640_v62 }
 0x32c   : > { %v2796_v61 = vadd.f32 %v2724_v36, %v2723_v7  ;;  %v2578_v46 = vadd.f32 %v4764_v53, %v2262_v57  ;;  %v2264_v9 = vpop.f32.mrb[54].mxu0  ;;  %v2490_v34 = vpop.f32.mrb[54].mxu1  ;;  %v2792_v43 = vadd.f32 %v2791_v10, %v2721_v35  ;;  %v2580_v14 = vadd.f32 %v4766_v3, %v2488_v59 }
 0x32d   : > { %v2641_v6 = vmax.f32 %v2577_v56, 0.0  ;;  %v2581_v18 = vadd.f32 %v4760_v22, %v2264_v9  ;;  %v2266_v48 = vpop.f32.mrb[55].mxu0  ;;  %v2492_v63 = vpop.f32.mrb[55].mxu1  ;;  %v2643_v38 = vmax.f32 %v2579_v40, 0.0  ;;  %v2583_v15 = vadd.f32 %v4762_v41, %v2490_v34 }
 0x32e   : > { %v2642_v42 = vmax.f32 %v2578_v46, 0.0  ;;  %v2582_v12 = vadd.f32 %v4764_v53, %v2266_v48  ;;  %v2584_v44 = vadd.f32 %v4766_v3, %v2492_v63  ;;  %v2644_v49 = vmax.f32 %v2580_v14, 0.0 }
 0x32f   : > { %v2727_v4 = vmul.f32 %v4769_v23, %v2641_v6  ;;  %v2645_v11 = vmax.f32 %v2581_v18, 0.0  ;;  %v2793_v2 = vadd.f32 %v2792_v43, %v2722_v31  ;;  %v2797_v8 = vadd.f32 %v2796_v61, %v2725_v60 }
 0x330   : > { %v2728_v32 = vmul.f32 %v4773_v33, %v2642_v42  ;;  %v2646_v37 = vmax.f32 %v2582_v12, 0.0  ;;  %v2729_v17 = vmul.f32 %v4776_v19, %v2643_v38  ;;  %v2647_v58 = vmax.f32 %v2583_v15, 0.0 }
 0x331   : > { %v2731_v51 = vmul.f32 %v4769_v23, %v2645_v11  ;;  %2794 = vadd.xlane.f32.xlu0 %v2793_v2  ;;  %v2798_v13 = vadd.f32 %v2797_v8, %v2726_v28  ;;  %v2648_v26 = vmax.f32 %v2584_v44, 0.0  ;;  %v2730_v35 = vmul.f32 %v4784_v5, %v2644_v49 }
 0x332   : > { %v2801_v24 = vadd.f32 %v2728_v32, %v2727_v4  ;;  %v2732_v25 = vmul.f32 %v4773_v33, %v2646_v37  ;;  %v2496_v27 = vpop.f32.mrb[56].mxu1  ;;  %v2270_v55 = vpop.f32.mrb[56].mxu0  ;;  %v2733_v56 = vmul.f32 %v4776_v19, %v2647_v58 }
 0x333   : > { %v2587_v1 = vadd.f32 %v4762_v41, %v2496_v27  ;;  %v2585_v16 = vadd.f32 %v4760_v22, %v2270_v55  ;;  %v2272_v45 = vpop.f32.mrb[57].mxu0  ;;  %v2498_v0 = vpop.f32.mrb[57].mxu1  ;;  %2799 = vadd.xlane.f32.xlu1 %v2798_v13  ;;  %v2734_v62 = vmul.f32 %v4784_v5, %v2648_v26 }
 0x334   : > { %v2806_v20 = vadd.f32 %v2732_v25, %v2731_v51  ;;  %v2586_v29 = vadd.f32 %v4764_v53, %v2272_v45  ;;  %v2274_v7 = vpop.f32.mrb[58].mxu0  ;;  %v2500_v30 = vpop.f32.mrb[58].mxu1  ;;  %v2802_v52 = vadd.f32 %v2801_v24, %v2729_v17  ;;  %v2588_v40 = vadd.f32 %v4766_v3, %v2498_v0 }
 0x335   : > { %v2649_v10 = vmax.f32 %v2585_v16, 0.0  ;;  %v2589_v21 = vadd.f32 %v4760_v22, %v2274_v7  ;;  %v2276_v36 = vpop.f32.mrb[59].mxu0  ;;  %v2502_v39 = vpop.f32.mrb[59].mxu1  ;;  %v2651_v47 = vmax.f32 %v2587_v1, 0.0  ;;  %v2591_v61 = vadd.f32 %v4762_v41, %v2500_v30 }
 0x336   : > { %v2650_v54 = vmax.f32 %v2586_v29, 0.0  ;;  %v2590_v50 = vadd.f32 %v4764_v53, %v2276_v36  ;;  %v2592_v43 = vadd.f32 %v4766_v3, %v2502_v39  ;;  %v2803_v6 = vadd.f32 %v2802_v52, %v2730_v35 }
 0x337   : > { %v2735_v57 = vmul.f32 %v4769_v23, %v2649_v10  ;;  %v2653_v59 = vmax.f32 %v2589_v21, 0.0  ;;  %v2807_v14 = vadd.f32 %v2806_v20, %v2733_v56  ;;  %v2737_v18 = vmul.f32 %v4776_v19, %v2651_v47 }
 0x338   : > { %v2736_v46 = vmul.f32 %v4773_v33, %v2650_v54  ;;  %v2654_v9 = vmax.f32 %v2590_v50, 0.0  ;;  %v2652_v63 = vmax.f32 %v2588_v40, 0.0  ;;  %v2655_v12 = vmax.f32 %v2591_v61, 0.0  ;;  %2804 = vadd.xlane.f32.xlu0 %v2803_v6 }
 0x339   : > { %v2739_v34 = vmul.f32 %v4769_v23, %v2653_v59  ;;  %v2808_v4 = vadd.f32 %v2807_v14, %v2734_v62  ;;  %v2656_v8 = vmax.f32 %v2592_v43, 0.0 }
 0x33a   : > { %v2811_v48 = vadd.f32 %v2736_v46, %v2735_v57  ;;  %v2740_v31 = vmul.f32 %v4773_v33, %v2654_v9  ;;  %v2506_v38 = vpop.f32.mrb[60].mxu1  ;;  %v2280_v42 = vpop.f32.mrb[60].mxu0  ;;  %v2738_v45 = vmul.f32 %v4784_v5, %v2652_v63  ;;  %v2741_v0 = vmul.f32 %v4776_v19, %v2655_v12 }
 0x33b   : > { %v2595_v60 = vadd.f32 %v4762_v41, %v2506_v38  ;;  %v2593_v11 = vadd.f32 %v4760_v22, %v2280_v42  ;;  %v2282_v15 = vpop.f32.mrb[61].mxu0  ;;  %v2508_v28 = vpop.f32.mrb[61].mxu1  ;;  %2809 = vadd.xlane.f32.xlu1 %v2808_v4  ;;  %v2742_v30 = vmul.f32 %v4784_v5, %v2656_v8 }
 0x33c   : > { %v2816_v32 = vadd.f32 %v2740_v31, %v2739_v34  ;;  %v2594_v37 = vadd.f32 %v4764_v53, %v2282_v15  ;;  %v2596_v44 = vadd.f32 %v4766_v3, %v2508_v28  ;;  %v2284_v49 = vpop.f32.mrb[62].mxu0  ;;  %v2510_v51 = vpop.f32.mrb[62].mxu1  ;;  %v2812_v2 = vadd.f32 %v2811_v48, %v2737_v18 }
 0x33d   : > { %v2657_v17 = vmax.f32 %v2593_v11, 0.0  ;;  %v2597_v24 = vadd.f32 %v4760_v22, %v2284_v49  ;;  %v2599_v25 = vadd.f32 %v4762_v41, %v2510_v51  ;;  %v2286_v27 = vpop.f32.mrb[63].mxu0  ;;  %v2512_v55 = vpop.f32.mrb[63].mxu1  ;;  %v2659_v58 = vmax.f32 %v2595_v60, 0.0 }
 0x33e   : > { %v2658_v1 = vmax.f32 %v2594_v37, 0.0  ;;  %v2598_v13 = vadd.f32 %v4764_v53, %v2286_v27  ;;  %v2600_v16 = vadd.f32 %v4766_v3, %v2512_v55  ;;  %v2660_v22 = vmax.f32 %v2596_v44, 0.0 }
 0x33f   : > { %v2743_v20 = vmul.f32 %v4769_v23, %v2657_v17  ;;  %v2661_v26 = vmax.f32 %v2597_v24, 0.0  ;;  %v2663_v7 = vmax.f32 %v2599_v25, 0.0  ;;  %v2813_v35 = vadd.f32 %v2812_v2, %v2738_v45 }
 0x340   : > { %v2744_v29 = vmul.f32 %v4773_v33, %v2658_v1  ;;  %v2662_v41 = vmax.f32 %v2598_v13, 0.0  ;;  %v2817_v53 = vadd.f32 %v2816_v32, %v2741_v0  ;;  %v2745_v3 = vmul.f32 %v4776_v19, %v2659_v58 }
 0x341   : > { %v2747_v52 = vmul.f32 %v4769_v23, %v2661_v26  ;;  %v2664_v36 = vmax.f32 %v2600_v16, 0.0  ;;  %2814 = vadd.xlane.f32.xlu0 %v2813_v35  ;;  %v2746_v47 = vmul.f32 %v4784_v5, %v2660_v22  ;;  %v2749_v54 = vmul.f32 %v4776_v19, %v2663_v7 }
 0x342   : > { %v2821_v10 = vadd.f32 %v2744_v29, %v2743_v20  ;;  %v2748_v21 = vmul.f32 %v4773_v33, %v2662_v41  ;;  %v2818_v39 = vadd.f32 %v2817_v53, %v2742_v30  ;;  %v2832_v33 = vstv %s2831_s8 }
 0x343   : > { %v2750_v23 = vmul.f32 %v4784_v5, %v2664_v36 }
 0x344   : > { %v2826_v40 = vadd.f32 %v2748_v21, %v2747_v52  ;;  %v2822_v50 = vadd.f32 %v2821_v10, %v2745_v3  ;;  %2819 = vadd.xlane.f32.xlu1 %v2818_v39 }
 0x346   : > { %v2823_v56 = vadd.f32 %v2822_v50, %v2746_v47  ;;  %v2827_v57 = vadd.f32 %v2826_v40, %v2749_v54 }
 0x348   : > { %2824 = vadd.xlane.f32.xlu0 %v2823_v56  ;;  %v2828_v59 = vadd.f32 %v2827_v57, %v2750_v23 }
 0x34a   : > { %2829 = vadd.xlane.f32.xlu1 %v2828_v59 }
 0x39d   : > { %v2755_v61 = vpop.xlane.xlu0 %2754 }
 0x39e   : > { %v2833_v62 = vadd.f32 %v2832_v33, %v2755_v61 }
 0x3a0   : > { %2850 = vst.msk [vmem:[%s4906_s10] sm:$0xff] %vm2849_vm3, %v2833_v62 }
 0x3a1   : > { %v2760_v19 = vpop.xlane.xlu0 %2759 }
 0x3a2   : > { %v2834_v5 = vadd.f32 %v2832_v33, %v2760_v19 }
 0x3a4   : > { %2851 = vst.msk [vmem:[%s4906_s10 + $0x8] sm:$0xff] %vm2849_vm3, %v2834_v5 }
 0x3a6   : > { %v2765_v46 = vpop.xlane.xlu1 %2764 }
 0x3a7   : > { %v2835_v9 = vadd.f32 %v2832_v33, %v2765_v46 }
 0x3a9   : > { %2852 = vst.msk [vmem:[%s4906_s10 + $0x10] sm:$0xff] %vm2849_vm3, %v2835_v9 }
 0x3aa   : > { %v2770_v34 = vpop.xlane.xlu1 %2769 }
 0x3ab   : > { %v2836_v43 = vadd.f32 %v2832_v33, %v2770_v34 }
 0x3ad   : > { %2853 = vst.msk [vmem:[%s4906_s10 + $0x18] sm:$0xff] %vm2849_vm3, %v2836_v43 }
 0x3ae   : > { %v2775_v6 = vpop.xlane.xlu0 %2774 }
 0x3af   : > { %v2837_v14 = vadd.f32 %v2832_v33, %v2775_v6 }
 0x3b0   : > { %v2780_v18 = vpop.xlane.xlu1 %2779 }
 0x3b1   : > { %2854 = vst.msk [vmem:[%s4906_s10 + $0x20] sm:$0xff] %vm2849_vm3, %v2837_v14  ;;  %v2838_v48 = vadd.f32 %v2832_v33, %v2780_v18 }
 0x3b3   : > { %2855 = vst.msk [vmem:[%s4906_s10 + $0x28] sm:$0xff] %vm2849_vm3, %v2838_v48 }
 0x3b5   : > { %v2785_v63 = vpop.xlane.xlu0 %2784 }
 0x3b6   : > { %v2839_v31 = vadd.f32 %v2832_v33, %v2785_v63 }
 0x3b8   : > { %v2790_v38 = vpop.xlane.xlu1 %2789  ;;  %2856 = vst.msk [vmem:[%s4906_s10 + $0x30] sm:$0xff] %vm2849_vm3, %v2839_v31 }
 0x3b9   : > { %v2840_v42 = vadd.f32 %v2832_v33, %v2790_v38 }
 0x3bb   : > { %2857 = vst.msk [vmem:[%s4906_s10 + $0x38] sm:$0xff] %vm2849_vm3, %v2840_v42 }
 0x3be   : > { %v2795_v12 = vpop.xlane.xlu0 %2794 }
 0x3bf   : > { %v2841_v60 = vadd.f32 %v2832_v33, %v2795_v12 }
 0x3c0   : > { %v2800_v4 = vpop.xlane.xlu1 %2799 }
 0x3c1   : > { %2858 = vst.msk [vmem:[%s4906_s10 + $0x40] sm:$0xff] %vm2849_vm3, %v2841_v60  ;;  %v2842_v11 = vadd.f32 %v2832_v33, %v2800_v4 }
 0x3c3   : > { %2859 = vst.msk [vmem:[%s4906_s10 + $0x48] sm:$0xff] %vm2849_vm3, %v2842_v11 }
 0x3c5   : > { %v2805_v15 = vpop.xlane.xlu0 %2804 }
 0x3c6   : > { %v2843_v28 = vadd.f32 %v2832_v33, %v2805_v15 }
 0x3c8   : > { %v2810_v32 = vpop.xlane.xlu1 %2809  ;;  %2860 = vst.msk [vmem:[%s4906_s10 + $0x50] sm:$0xff] %vm2849_vm3, %v2843_v28 }
 0x3c9   : > { %v2844_v37 = vadd.f32 %v2832_v33, %v2810_v32 }
 0x3cb   : > { %2861 = vst.msk [vmem:[%s4906_s10 + $0x58] sm:$0xff] %vm2849_vm3, %v2844_v37 }
 0x3ce   : > { %v2815_v44 = vpop.xlane.xlu0 %2814 }
 0x3cf   : > { %v2845_v49 = vadd.f32 %v2832_v33, %v2815_v44 }
 0x3d1   : > { %v2820_v51 = vpop.xlane.xlu1 %2819  ;;  %2862 = vst.msk [vmem:[%s4906_s10 + $0x60] sm:$0xff] %vm2849_vm3, %v2845_v49 }
 0x3d2   : > { %v2846_v2 = vadd.f32 %v2832_v33, %v2820_v51 }
 0x3d4   : > { %2863 = vst.msk [vmem:[%s4906_s10 + $0x68] sm:$0xff] %vm2849_vm3, %v2846_v2 }
 0x3d5   : > { %v2825_v8 = vpop.xlane.xlu0 %2824 }
 0x3d6   : > { %v2847_v17 = vadd.f32 %v2832_v33, %v2825_v8 }
 0x3d7   : > { %v2830_v24 = vpop.xlane.xlu1 %2829 }
 0x3d8   : > { %2864 = vst.msk [vmem:[%s4906_s10 + $0x70] sm:$0xff] %vm2849_vm3, %v2847_v17  ;;  %v2848_v25 = vadd.f32 %v2832_v33, %v2830_v24 }
 0x3da   : > { %2865 = vst.msk [vmem:[%s4906_s10 + $0x78] sm:$0xff] %vm2849_vm3, %v2848_v25 }
 0x3db   : > { %3954 = shalt.err (!%p3951_p3)
}
 0x3dc   : > { %s3955_s28 = scalar_lea.hbm %s4941_s3, 2048  ;;  %s3959_s4 = scalar_lea.hbm %s5000_s9, 4096 }
 0x3dd   : > { %p3956_p12 = scmp.ne.s32.totalorder %s4941_s3, %s3955_s28  ;;  %p3960_p0 = scmp.lt.u32.totalorder %s4941_s3, %s5000_s9 }
 0x3de   : > { %p3961_p6 = scmp.lt.u32.totalorder %s3959_s4, %s3955_s28  ;;  %p3963_p4 = scmp.lt.u32.totalorder %s3955_s28, %s4941_s3 }
 0x3df   : > { %p3957_p1 = pnand %p3956_p12, %p5036_p10 }
 0x3e0   : > { %p3962_p2 = por %p3961_p6, %p3960_p0 }
 0x3e1   : > { %p3958_p13 = pneg %p3957_p1 }
 0x3e2   : > { %p3964_p5 = por %p3963_p4, %p3962_p2 }
 0x3e4   : > { %p3965_p7 = pnand %p3964_p5, %p3958_p13 }
 0x3e6   : > { %3968 = shalt.err (!%p3965_p7)
}
 0x3e7   : > { %s4045_s18 = smov 128   ;;  %s4046_s10 = smov 8  }
 0x3e8   : > { %3405 = dma.vmem_to_hbm [thread:$0]  (%p5036_p10), %s4943_s22, 2048, %s4941_s3, %s2867_s16, %s4045_s18, %s4045_s18, %s4046_s10  }
 0x3e9 PF: > { %s2895_s19 = sand.u32 1, %s4015_s11   ;;  %p5037_p9 = scmp.ne.s32.totalorder %s5023_s29, 0 }
 0x3ea   : > { %p5038_p8 = scmp.ge.s32.totalorder %s4027_s14, 2  ;;  %s2896_s23 = scalar_lea.sflag [#allocation5], %s2895_s19 }
 0x3ec   : > { %p3434_p11 = pnand %p5038_p8, %p5037_p9 }
 0x3ee   : > { %4010 = dma.done.wait (!%p3434_p11), %s2896_s23, 2048  }
 0x3ef   : > { %4012 = vsyncadd (!%p3434_p11), %s2896_s23, 4294965248  ;;  %p29_p3 = scmp.ge.s32.totalorder %s4282_s20, 4   ;;  %s5039_s11 = smov %s4019_s12 }
 0x3f0   : > { %s5040_s12 = smov %s4023_s13  ;;  %s5041_s13 = smov %s4293_s21 }
 0x3f1   : > { %s5042_s14 = smov %s4282_s20  ;;  %31 = sbr.rel (!%p29_p3) target bundleno = 17 (0x11), region = 138 }
 0x3f8   :  { %2901 = vsyncpa [#allocation4], 1 }
 0x3f9   :  { %2903 = vsyncpa [#allocation4 + $0x1], 1 }
 0x3fa   :  { %2904 = vsyncpa [#allocation7], 1 }
 0x3fb   :  { %2906 = vsyncpa [#allocation7 + $0x1], 1 }
 0x3fc   :  { %2907 = vsyncpa [#allocation10], 1 }
 0x3fd   :  { %2908 = vsyncpa [#allocation13], 1 }
 0x3fe   :  { %2909 = vsyncpa [#allocation16], 1 }
 0x3ff   :  { %2910 = vsyncpa [#allocation5], 1 }
 0x400   :  { %2912 = vsyncpa [#allocation5 + $0x1], 1 }

</bundles_post_ra>
